<compile_context>
chip_gen: v6e
topology: v6e:2x2x1
jax: 0.10.0
libtpu: 0.0.40
codegen_flags: <defaults>
</compile_context>

<pallas_src>
import jax
import jax.numpy as jnp
from jax.experimental import pallas as pl
from jax.experimental.pallas import tpu as pltpu

LANE = 128


def _round_up(x, m):
    return ((x + m - 1) // m) * m


def _softmax_last(logits):
    # softmax over the class axis (last axis of the fused [TE, C] slab)
    m = jnp.max(logits, axis=-1, keepdims=True)
    e = jnp.exp(logits - m)
    return e * pl.reciprocal(jnp.sum(e, axis=-1, keepdims=True), approx=False)


# ------------------- stage 1: edge messages + scatter-add -------------------

def aggregate_kernel(x_ref, src_ref, dst_ref, dstT_ref, eattr_ref,
                     wei_ref, wej_ref, be_ref, wa_ref, ba_ref, expand_ref,
                     aggr_ref, li_ref):
    """Grid = (plane ["parallel"], edge-tile ["arbitrary"]).

    x_ref     : [N, CFp] f32     node features of this plane (resident)
    src_ref   : [TE, N] bf16     one-hot of edge_index[0] (source j), edge tile
    dst_ref   : [TE, N] bf16     one-hot of edge_index[1] (target i), edge tile
    dstT_ref  : [N, TE] bf16     transposed dst one-hot (native scatter matmul)
    eattr_ref : [TE, CDep] f32   edge attributes, edge tile
    w*/b*     : block-diagonal packed ClassLinear weights / flattened biases
    expand_ref: [C, CFp]         repeats a per-class weight across its F lanes
    aggr_ref  : [N, CFp] f32     OUTPUT; doubles as the scatter-add accumulator
    li_ref    : [N, C] f32       scratch: per-node dst-side edge-logit term
    """
    k = pl.program_id(1)

    @pl.when(k == 0)
    def _init():
        aggr_ref[...] = jnp.zeros_like(aggr_ref)
        # x_i only feeds the edge logits -> precompute x @ W_e^(i) once per plane
        li_ref[...] = jnp.dot(x_ref[...], wei_ref[...],
                              preferred_element_type=jnp.float32)

    x2d = x_ref[...]                                                  # [N, CFp]

    # gathers: bf16 one-hot x f32 (exact).  TODO(synk): index-based gather O(E*CF).
    xj = jnp.dot(src_ref[...], x2d,
                 preferred_element_type=jnp.float32)                  # [TE, CFp]
    li_e = jnp.dot(dst_ref[...], li_ref[...],
                   preferred_element_type=jnp.float32)                # [TE, C]

    e_logits = (li_e
                + jnp.dot(xj, wej_ref[...], preferred_element_type=jnp.float32)
                + be_ref[...])                                        # [TE, C]
    a_logits = (jnp.dot(eattr_ref[...], wa_ref[...],
                        preferred_element_type=jnp.float32)
                + ba_ref[...])                                        # [TE, C]

    ew = _softmax_last(e_logits)
    aw = _softmax_last(a_logits)

    # expand the per-class weight across that class's feature lanes
    w_rep = jnp.dot(ew * aw, expand_ref[...],
                    preferred_element_type=jnp.float32)               # [TE, CFp]
    msg = w_rep * xj                                                  # [TE, CFp]

    # native-orientation scatter-add: [N, TE] @ [TE, CFp]
    aggr_ref[...] += jnp.dot(dstT_ref[...], msg,
                             preferred_element_type=jnp.float32)


# ---------------- stage 2: node-update MLP (node-tiled, parallel) ----------------

def node_mlp_kernel(x_ref, aggr_ref, wn1x_ref, wn1a_ref, bn1_ref,
                    wn2_ref, bn2_ref, out_ref):
    """Grid = (plane, node-tile), both "parallel".  ClassLinear/Tanh MLP."""
    h = jnp.tanh(
        jnp.dot(x_ref[...], wn1x_ref[...], preferred_element_type=jnp.float32)
        + jnp.dot(aggr_ref[...], wn1a_ref[...], preferred_element_type=jnp.float32)
        + bn1_ref[...])                                               # [TN, CPp]
    out_ref[...] = jnp.tanh(
        jnp.dot(h, wn2_ref[...], preferred_element_type=jnp.float32)
        + bn2_ref[...])                                               # [TN, CPp]


# ----------------------------- host-side wrapper -----------------------------

def _pack_block_diag(w):
    """[C, Fin, Fout] per-class weights -> [C*Fin, C*Fout] block-diagonal."""
    C, fin, fout = w.shape
    eye = jnp.eye(C, dtype=w.dtype)
    return jnp.einsum("cio,cd->cido", w, eye).reshape(C * fin, C * fout)


def _pad_to(a, shape):
    return jnp.pad(a, [(0, t - s) for s, t in zip(a.shape, shape)])


def distance_aware_plane_net(x, edge_index, edge_attr, params, num_classes,
                             edge_tile=256, node_tile=128):
    """Forward of DistanceAwarePlaneNet (one EdgeMessagePassing2D per plane),
    all planes fused into two pallas_calls."""
    planes = list(x.keys())
    Pl = len(planes)
    N, C, F = x[planes[0]].shape
    E = edge_index[planes[0]].shape[1]
    De = edge_attr[planes[0]].shape[-1]
    P = params[planes[0]]["w_n2"].shape[-1]
    for p in planes:  # toy wrapper: planes share N/E (pad to max otherwise)
        assert x[p].shape == (N, C, F) and edge_index[p].shape == (2, E)

    CF, CDe, CP = C * F, C * De, C * P
    CFp = _round_up(CF, LANE)
    CDep = _round_up(CDe, LANE)
    CPp = _round_up(CP, LANE)
    node_tile = min(node_tile, _round_up(N, 8))
    N_pad = _round_up(N, node_tile)
    E_pad = _round_up(E, edge_tile)          # edge_tile multiple of 16 (bf16 sublane)

    # ---- pack & pad per-plane tensors into lane-dense slabs, stack over planes ----
    x_l, ea_l, src_l, dst_l, dstT_l = [], [], [], [], []
    wei_l, wej_l, be_l, wa_l, ba_l = [], [], [], [], []
    wn1x_l, wn1a_l, bn1_l, wn2_l, bn2_l = [], [], [], [], []
    for p in planes:
        prm = params[p]
        x_l.append(_pad_to(x[p].reshape(N, CF), (N_pad, CFp)))
        ea_l.append(_pad_to(edge_attr[p].reshape(E, CDe), (E_pad, CDep)))
        # padded edges use index -1 -> all-zero one-hot rows/cols (no-op edges)
        src_i = jnp.pad(edge_index[p][0], (0, E_pad - E), constant_values=-1)
        dst_i = jnp.pad(edge_index[p][1], (0, E_pad - E), constant_values=-1)
        src_oh = jax.nn.one_hot(src_i, N_pad, dtype=jnp.bfloat16)   # [E_pad, N_pad]
        dst_oh = jax.nn.one_hot(dst_i, N_pad, dtype=jnp.bfloat16)   # [E_pad, N_pad]
        src_l.append(src_oh)
        dst_l.append(dst_oh)
        dstT_l.append(dst_oh.T)                                     # [N_pad, E_pad]
        wei_l.append(_pad_to(_pack_block_diag(prm["w_e"][:, :F, :]), (CFp, C)))
        wej_l.append(_pad_to(_pack_block_diag(prm["w_e"][:, F:, :]), (CFp, C)))
        be_l.append(prm["b_e"].reshape(1, C))
        wa_l.append(_pad_to(_pack_block_diag(prm["w_a"]), (CDep, C)))
        ba_l.append(prm["b_a"].reshape(1, C))
        wn1x_l.append(_pad_to(_pack_block_diag(prm["w_n1"][:, :F, :]), (CFp, CPp)))
        wn1a_l.append(_pad_to(_pack_block_diag(prm["w_n1"][:, F:, :]), (CFp, CPp)))
        bn1_l.append(_pad_to(prm["b_n1"].reshape(1, CP), (1, CPp)))
        wn2_l.append(_pad_to(_pack_block_diag(prm["w_n2"]), (CPp, CPp)))
        bn2_l.append(_pad_to(prm["b_n2"].reshape(1, CP), (1, CPp)))

    stack = lambda lst: jnp.stack(lst, axis=0)
    x_all, ea_all = stack(x_l), stack(ea_l)
    src_all, dst_all, dstT_all = stack(src_l), stack(dst_l), stack(dstT_l)
    wei, wej, be = stack(wei_l), stack(wej_l), stack(be_l)
    wa, ba = stack(wa_l), stack(ba_l)
    wn1x, wn1a, bn1 = stack(wn1x_l), stack(wn1a_l), stack(bn1_l)
    wn2, bn2 = stack(wn2_l), stack(bn2_l)

    # class-weight -> feature-lane expansion matrix (shared by all planes)
    expand = _pad_to(jnp.repeat(jnp.eye(C, dtype=jnp.float32), F, axis=1),
                     (C, CFp))                                       # [C, CFp]

    vmem_bytes = 64 * 1024 * 1024   # re-derive per generation (48-56 MiB on v7x)

    # ---------------- stage 1: edge messages + scatter-add ----------------
    aggr = pl.pallas_call(
        aggregate_kernel,
        out_shape=jax.ShapeDtypeStruct((Pl, N_pad, CFp), jnp.float32),
        grid=(Pl, E_pad // edge_tile),
        in_specs=[
            pl.BlockSpec((None, N_pad, CFp), lambda p, k: (p, 0, 0)),        # x
            pl.BlockSpec((None, edge_tile, N_pad), lambda p, k: (p, k, 0)),  # src 1-hot
            pl.BlockSpec((None, edge_tile, N_pad), lambda p, k: (p, k, 0)),  # dst 1-hot
            pl.BlockSpec((None, N_pad, edge_tile), lambda p, k: (p, 0, k)),  # dst 1-hot^T
            pl.BlockSpec((None, edge_tile, CDep), lambda p, k: (p, k, 0)),   # edge attr
            pl.BlockSpec((None, CFp, C), lambda p, k: (p, 0, 0)),            # w_e (dst)
            pl.BlockSpec((None, CFp, C), lambda p, k: (p, 0, 0)),            # w_e (src)
            pl.BlockSpec((None, 1, C), lambda p, k: (p, 0, 0)),              # b_e
            pl.BlockSpec((None, CDep, C), lambda p, k: (p, 0, 0)),           # w_a
            pl.BlockSpec((None, 1, C), lambda p, k: (p, 0, 0)),              # b_a
            pl.BlockSpec((C, CFp), lambda p, k: (0, 0)),                     # expand
        ],
        out_specs=pl.BlockSpec((None, N_pad, CFp), lambda p, k: (p, 0, 0)),
        scratch_shapes=[pltpu.VMEM((N_pad, C), jnp.float32)],                # li
        compiler_params=pltpu.CompilerParams(
            dimension_semantics=("parallel", "arbitrary"),
            vmem_limit_bytes=vmem_bytes),
    )(x_all, src_all, dst_all, dstT_all, ea_all,
      wei, wej, be, wa, ba, expand)

    # ---------------- stage 2: node update MLP (node-tiled) ----------------
    out_all = pl.pallas_call(
        node_mlp_kernel,
        out_shape=jax.ShapeDtypeStruct((Pl, N_pad, CPp), jnp.float32),
        grid=(Pl, N_pad // node_tile),
        in_specs=[
            pl.BlockSpec((None, node_tile, CFp), lambda p, n: (p, n, 0)),    # x
            pl.BlockSpec((None, node_tile, CFp), lambda p, n: (p, n, 0)),    # aggr
            pl.BlockSpec((None, CFp, CPp), lambda p, n: (p, 0, 0)),          # w_n1 (x)
            pl.BlockSpec((None, CFp, CPp), lambda p, n: (p, 0, 0)),          # w_n1 (aggr)
            pl.BlockSpec((None, 1, CPp), lambda p, n: (p, 0, 0)),            # b_n1
            pl.BlockSpec((None, CPp, CPp), lambda p, n: (p, 0, 0)),          # w_n2
            pl.BlockSpec((None, 1, CPp), lambda p, n: (p, 0, 0)),            # b_n2
        ],
        out_specs=pl.BlockSpec((None, node_tile, CPp), lambda p, n: (p, n, 0)),
        compiler_params=pltpu.CompilerParams(
            dimension_semantics=("parallel", "parallel"),
            vmem_limit_bytes=vmem_bytes),
    )(x_all, aggr, wn1x, wn1a, bn1, wn2, bn2)

    return {p: out_all[pi, :N, :CP].reshape(N, C, P)
            for pi, p in enumerate(planes)}


# ------------------- deterministic parameter init (synthetic) -------------------

def init_class_linear(key, in_f, out_f, num_classes):
    k1, k2 = jax.random.split(key)
    bound = 1.0 / (in_f ** 0.5)
    w = jax.random.uniform(k1, (num_classes, in_f, out_f), jnp.float32, -bound, bound)
    b = jax.random.uniform(k2, (num_classes, 1, out_f), jnp.float32, -bound, bound)
    return w, b


def init_plane_params(key, in_features, planar_features, edge_features, num_classes):
    F2 = 2 * (in_features + planar_features)
    k1, k2, k3, k4 = jax.random.split(key, 4)
    w_e, b_e = init_class_linear(k1, F2, 1, num_classes)
    w_a, b_a = init_class_linear(k2, edge_features, 1, num_classes)
    w_n1, b_n1 = init_class_linear(k3, F2, planar_features, num_classes)
    w_n2, b_n2 = init_class_linear(k4, planar_features, planar_features, num_classes)
    return dict(w_e=w_e, b_e=b_e, w_a=w_a, b_a=b_a,
                w_n1=w_n1, b_n1=b_n1, w_n2=w_n2, b_n2=b_n2)


# ---------------- pure-JAX reference (matches the PyTorch semantics) ----------------

def _class_linear_ref(x, w, b):
    # x: [M, C, Fin], w: [C, Fin, Fout], b: [C, 1, Fout]
    return jnp.einsum("mcf,cfo->mco", x, w) + b[:, 0, :][None]


def edge_mp2d_ref(x, edge_index, edge_attr, p):
    src, dst = edge_index[0], edge_index[1]
    x_j, x_i = x[src], x[dst]
    nf = jnp.concatenate([x_i, x_j], axis=-1)
    ew = jax.nn.softmax(_class_linear_ref(nf, p["w_e"], p["b_e"]), axis=1)
    aw = jax.nn.softmax(_class_linear_ref(edge_attr, p["w_a"], p["b_a"]), axis=1)
    msg = ew * aw * x_j
    aggr = jnp.zeros_like(x).at[dst].add(msg)
    h = jnp.concatenate([x, aggr], axis=-1)
    h = jnp.tanh(_class_linear_ref(h, p["w_n1"], p["b_n1"]))
    h = jnp.tanh(_class_linear_ref(h, p["w_n2"], p["b_n2"]))
    return h


if __name__ == "__main__":
    in_features, planar_features, edge_features, num_classes = 4, 8, 6, 5
    planes = ["u", "v", "y"]
    N, E = 16, 32
    F = in_features + planar_features

    key = jax.random.PRNGKey(0)
    x, edge_index, edge_attr, params = {}, {}, {}, {}
    for p in planes:
        key, k1, k2, k3, k4 = jax.random.split(key, 5)
        x[p] = jax.random.normal(k1, (N, num_classes, F), jnp.float32)
        edge_index[p] = jax.random.randint(k2, (2, E), 0, N, dtype=jnp.int32)
        edge_attr[p] = jax.random.normal(
            k3, (E, num_classes, edge_features), jnp.float32)
        params[p] = init_plane_params(
            k4, in_features, planar_features, edge_features, num_classes)

    out = distance_aware_plane_net(x, edge_index, edge_attr, params, num_classes)
    for p in planes:
        jax.block_until_ready(out[p])
        ref = edge_mp2d_ref(x[p], edge_index[p], edge_attr[p], params[p])
        assert out[p].shape == (N, num_classes, planar_features)
        assert jnp.allclose(out[p], ref, atol=1e-4, rtol=1e-4), f"mismatch in plane {p}"

    print("KERNEL_OK")
</pallas_src>

<mosaic_0001>
module attributes {stable_mosaic.version = 11 : i64} {
  func.func @aggregate_kernel(%arg0: i32, %arg1: i32, %arg2: memref<1x16x128xf32, #tpu.memory_space<vmem>>, %arg3: memref<1x256x16xbf16, #tpu.memory_space<vmem>>, %arg4: memref<1x256x16xbf16, #tpu.memory_space<vmem>>, %arg5: memref<1x16x256xbf16, #tpu.memory_space<vmem>>, %arg6: memref<1x256x128xf32, #tpu.memory_space<vmem>>, %arg7: memref<1x128x5xf32, #tpu.memory_space<vmem>>, %arg8: memref<1x128x5xf32, #tpu.memory_space<vmem>>, %arg9: memref<1x1x5xf32, #tpu.memory_space<vmem>>, %arg10: memref<1x128x5xf32, #tpu.memory_space<vmem>>, %arg11: memref<1x1x5xf32, #tpu.memory_space<vmem>>, %arg12: memref<5x128xf32, #tpu.memory_space<vmem>>, %arg13: memref<1x16x128xf32, #tpu.memory_space<vmem>>, %arg14: memref<16x5xf32, #tpu.memory_space<vmem>>) attributes {dimension_semantics = [#tpu.dimension_semantics<parallel>, #tpu.dimension_semantics<arbitrary>], iteration_bounds = array<i64: 3, 1>, scalar_prefetch = 0 : i64, scratch_operands = 1 : i64, tpu.core_type = #tpu.core_type<tc>, window_params = [{transform_indices = @transform_0, window_bounds = array<i64: 1, 16, 128>}, {transform_indices = @transform_1, window_bounds = array<i64: 1, 256, 16>}, {transform_indices = @transform_2, window_bounds = array<i64: 1, 256, 16>}, {transform_indices = @transform_3, window_bounds = array<i64: 1, 16, 256>}, {transform_indices = @transform_4, window_bounds = array<i64: 1, 256, 128>}, {transform_indices = @transform_5, window_bounds = array<i64: 1, 128, 5>}, {transform_indices = @transform_6, window_bounds = array<i64: 1, 128, 5>}, {transform_indices = @transform_7, window_bounds = array<i64: 1, 1, 5>}, {transform_indices = @transform_8, window_bounds = array<i64: 1, 128, 5>}, {transform_indices = @transform_9, window_bounds = array<i64: 1, 1, 5>}, {pipeline_mode = #tpu.pipeline_mode<synchronous>, transform_indices = @transform_10, window_bounds = array<i64: 5, 128>}, {transform_indices = @transform_11, window_bounds = array<i64: 1, 16, 128>}]} {
    %c0_i32 = arith.constant 0 : i32
    %0 = arith.cmpi eq, %arg1, %c0_i32 : i32
    %1 = arith.extui %0 : i1 to i32
    %c0_i32_0 = arith.constant 0 : i32
    %2 = arith.cmpi ne, %1, %c0_i32_0 : i32
    scf.if %2 {
      %cst_46 = arith.constant 0.000000e+00 : f32
      %62 = vector.broadcast %cst_46 : f32 to vector<16x128xf32>
      %c0_47 = arith.constant 0 : index
      %c0_48 = arith.constant 0 : index
      %c0_49 = arith.constant 0 : index
      %63 = vector.load %arg13[%c0_47, %c0_48, %c0_49] : memref<1x16x128xf32, #tpu.memory_space<vmem>>, vector<1x16x128xf32>
      %64 = vector.shape_cast %63 : vector<1x16x128xf32> to vector<16x128xf32>
      %65 = vector.shape_cast %62 : vector<16x128xf32> to vector<1x16x128xf32>
      tpu.vector_store %arg13[%c0_47, %c0_48, %c0_49], %65 {strides = array<i32>} : memref<1x16x128xf32, #tpu.memory_space<vmem>>, vector<1x16x128xf32>,
      %c0_50 = arith.constant 0 : index
      %c0_51 = arith.constant 0 : index
      %c0_52 = arith.constant 0 : index
      %66 = vector.load %arg2[%c0_50, %c0_51, %c0_52] : memref<1x16x128xf32, #tpu.memory_space<vmem>>, vector<1x16x128xf32>
      %67 = vector.shape_cast %66 : vector<1x16x128xf32> to vector<16x128xf32>
      %c0_53 = arith.constant 0 : index
      %c0_54 = arith.constant 0 : index
      %c0_55 = arith.constant 0 : index
      %68 = vector.load %arg7[%c0_53, %c0_54, %c0_55] : memref<1x128x5xf32, #tpu.memory_space<vmem>>, vector<1x128x5xf32>
      %69 = vector.shape_cast %68 : vector<1x128x5xf32> to vector<128x5xf32>
      %cst_56 = arith.constant dense<0.000000e+00> : vector<16x5xf32>
      %70 = tpu.matmul %67, %69, %cst_56 {dimension_numbers = #tpu.dot_dimension_numbers<[1], [0], [0], [1], [0, 0, 1, 1], [], []>} : vector<16x128xf32>, vector<128x5xf32>, vector<16x5xf32> -> vector<16x5xf32>
      %c0_57 = arith.constant 0 : index
      %c0_58 = arith.constant 0 : index
      %71 = vector.load %arg14[%c0_57, %c0_58] : memref<16x5xf32, #tpu.memory_space<vmem>>, vector<16x5xf32>
      tpu.vector_store %arg14[%c0_57, %c0_58], %70 {strides = array<i32>} : memref<16x5xf32, #tpu.memory_space<vmem>>, vector<16x5xf32>,
    } else {
    }
    %c0 = arith.constant 0 : index
    %c0_1 = arith.constant 0 : index
    %c0_2 = arith.constant 0 : index
    %3 = vector.load %arg2[%c0, %c0_1, %c0_2] : memref<1x16x128xf32, #tpu.memory_space<vmem>>, vector<1x16x128xf32>
    %4 = vector.shape_cast %3 : vector<1x16x128xf32> to vector<16x128xf32>
    %c0_3 = arith.constant 0 : index
    %c0_4 = arith.constant 0 : index
    %c0_5 = arith.constant 0 : index
    %5 = vector.load %arg3[%c0_3, %c0_4, %c0_5] : memref<1x256x16xbf16, #tpu.memory_space<vmem>>, vector<1x256x16xbf16>
    %6 = vector.shape_cast %5 : vector<1x256x16xbf16> to vector<256x16xbf16>
    %cst = arith.constant dense<0.000000e+00> : vector<256x128xf32>
    %7 = tpu.matmul %6, %4, %cst {dimension_numbers = #tpu.dot_dimension_numbers<[1], [0], [0], [1], [0, 0, 1, 1], [], []>} : vector<256x16xbf16>, vector<16x128xf32>, vector<256x128xf32> -> vector<256x128xf32>
    %c0_6 = arith.constant 0 : index
    %c0_7 = arith.constant 0 : index
    %c0_8 = arith.constant 0 : index
    %8 = vector.load %arg4[%c0_6, %c0_7, %c0_8] : memref<1x256x16xbf16, #tpu.memory_space<vmem>>, vector<1x256x16xbf16>
    %9 = vector.shape_cast %8 : vector<1x256x16xbf16> to vector<256x16xbf16>
    %c0_9 = arith.constant 0 : index
    %c0_10 = arith.constant 0 : index
    %10 = vector.load %arg14[%c0_9, %c0_10] : memref<16x5xf32, #tpu.memory_space<vmem>>, vector<16x5xf32>
    %cst_11 = arith.constant dense<0.000000e+00> : vector<256x5xf32>
    %11 = tpu.matmul %9, %10, %cst_11 {dimension_numbers = #tpu.dot_dimension_numbers<[1], [0], [0], [1], [0, 0, 1, 1], [], []>} : vector<256x16xbf16>, vector<16x5xf32>, vector<256x5xf32> -> vector<256x5xf32>
    %c0_12 = arith.constant 0 : index
    %c0_13 = arith.constant 0 : index
    %c0_14 = arith.constant 0 : index
    %12 = vector.load %arg8[%c0_12, %c0_13, %c0_14] : memref<1x128x5xf32, #tpu.memory_space<vmem>>, vector<1x128x5xf32>
    %13 = vector.shape_cast %12 : vector<1x128x5xf32> to vector<128x5xf32>
    %cst_15 = arith.constant dense<0.000000e+00> : vector<256x5xf32>
    %14 = tpu.matmul %7, %13, %cst_15 {dimension_numbers = #tpu.dot_dimension_numbers<[1], [0], [0], [1], [0, 0, 1, 1], [], []>} : vector<256x128xf32>, vector<128x5xf32>, vector<256x5xf32> -> vector<256x5xf32>
    %15 = arith.addf %11, %14 : vector<256x5xf32>
    %c0_16 = arith.constant 0 : index
    %c0_17 = arith.constant 0 : index
    %c0_18 = arith.constant 0 : index
    %16 = vector.load %arg9[%c0_16, %c0_17, %c0_18] : memref<1x1x5xf32, #tpu.memory_space<vmem>>, vector<1x1x5xf32>
    %17 = vector.shape_cast %16 : vector<1x1x5xf32> to vector<1x5xf32>
    %18 = vector.broadcast %17 : vector<1x5xf32> to vector<256x5xf32>
    %19 = arith.addf %15, %18 : vector<256x5xf32>
    %c0_19 = arith.constant 0 : index
    %c0_20 = arith.constant 0 : index
    %c0_21 = arith.constant 0 : index
    %20 = vector.load %arg6[%c0_19, %c0_20, %c0_21] : memref<1x256x128xf32, #tpu.memory_space<vmem>>, vector<1x256x128xf32>
    %21 = vector.shape_cast %20 : vector<1x256x128xf32> to vector<256x128xf32>
    %c0_22 = arith.constant 0 : index
    %c0_23 = arith.constant 0 : index
    %c0_24 = arith.constant 0 : index
    %22 = vector.load %arg10[%c0_22, %c0_23, %c0_24] : memref<1x128x5xf32, #tpu.memory_space<vmem>>, vector<1x128x5xf32>
    %23 = vector.shape_cast %22 : vector<1x128x5xf32> to vector<128x5xf32>
    %cst_25 = arith.constant dense<0.000000e+00> : vector<256x5xf32>
    %24 = tpu.matmul %21, %23, %cst_25 {dimension_numbers = #tpu.dot_dimension_numbers<[1], [0], [0], [1], [0, 0, 1, 1], [], []>} : vector<256x128xf32>, vector<128x5xf32>, vector<256x5xf32> -> vector<256x5xf32>
    %c0_26 = arith.constant 0 : index
    %c0_27 = arith.constant 0 : index
    %c0_28 = arith.constant 0 : index
    %25 = vector.load %arg11[%c0_26, %c0_27, %c0_28] : memref<1x1x5xf32, #tpu.memory_space<vmem>>, vector<1x1x5xf32>
    %26 = vector.shape_cast %25 : vector<1x1x5xf32> to vector<1x5xf32>
    %27 = vector.broadcast %26 : vector<1x5xf32> to vector<256x5xf32>
    %28 = arith.addf %24, %27 : vector<256x5xf32>
    %cst_29 = arith.constant dense<0xFF800000> : vector<256xf32>
    %29 = vector.multi_reduction <maximumf>, %19, %cst_29 [1] : vector<256x5xf32> to vector<256xf32>
    %30 = vector.shape_cast %29 : vector<256xf32> to vector<256x1xf32>
    %31 = vector.broadcast %30 : vector<256x1xf32> to vector<256x5xf32>
    %32 = arith.subf %19, %31 : vector<256x5xf32>
    %33 = math.exp %32 : vector<256x5xf32>
    %cst_30 = arith.constant dense<0.000000e+00> : vector<256xf32>
    %34 = vector.multi_reduction <add>, %33, %cst_30 [1] : vector<256x5xf32> to vector<256xf32>
    %35 = vector.shape_cast %34 : vector<256xf32> to vector<256x1xf32>
    %36 = tpu.reciprocal %35 : vector<256x1xf32> -> vector<256x1xf32>
    %37 = vector.broadcast %36 : vector<256x1xf32> to vector<256x5xf32>
    %38 = arith.mulf %33, %37 : vector<256x5xf32>
    %cst_31 = arith.constant dense<0xFF800000> : vector<256xf32>
    %39 = vector.multi_reduction <maximumf>, %28, %cst_31 [1] : vector<256x5xf32> to vector<256xf32>
    %40 = vector.shape_cast %39 : vector<256xf32> to vector<256x1xf32>
    %41 = vector.broadcast %40 : vector<256x1xf32> to vector<256x5xf32>
    %42 = arith.subf %28, %41 : vector<256x5xf32>
    %43 = math.exp %42 : vector<256x5xf32>
    %cst_32 = arith.constant dense<0.000000e+00> : vector<256xf32>
    %44 = vector.multi_reduction <add>, %43, %cst_32 [1] : vector<256x5xf32> to vector<256xf32>
    %45 = vector.shape_cast %44 : vector<256xf32> to vector<256x1xf32>
    %46 = tpu.reciprocal %45 : vector<256x1xf32> -> vector<256x1xf32>
    %47 = vector.broadcast %46 : vector<256x1xf32> to vector<256x5xf32>
    %48 = arith.mulf %43, %47 : vector<256x5xf32>
    %49 = arith.mulf %38, %48 : vector<256x5xf32>
    %c0_33 = arith.constant 0 : index
    %c0_34 = arith.constant 0 : index
    %50 = vector.load %arg12[%c0_33, %c0_34] : memref<5x128xf32, #tpu.memory_space<vmem>>, vector<5x128xf32>
    %cst_35 = arith.constant dense<0.000000e+00> : vector<256x128xf32>
    %51 = tpu.matmul %49, %50, %cst_35 {dimension_numbers = #tpu.dot_dimension_numbers<[1], [0], [0], [1], [0, 0, 1, 1], [], []>} : vector<256x5xf32>, vector<5x128xf32>, vector<256x128xf32> -> vector<256x128xf32>
    %52 = arith.mulf %51, %7 : vector<256x128xf32>
    %c0_36 = arith.constant 0 : index
    %c0_37 = arith.constant 0 : index
    %c0_38 = arith.constant 0 : index
    %53 = vector.load %arg13[%c0_36, %c0_37, %c0_38] : memref<1x16x128xf32, #tpu.memory_space<vmem>>, vector<1x16x128xf32>
    %54 = vector.shape_cast %53 : vector<1x16x128xf32> to vector<16x128xf32>
    %c0_39 = arith.constant 0 : index
    %c0_40 = arith.constant 0 : index
    %c0_41 = arith.constant 0 : index
    %55 = vector.load %arg5[%c0_39, %c0_40, %c0_41] : memref<1x16x256xbf16, #tpu.memory_space<vmem>>, vector<1x16x256xbf16>
    %56 = vector.shape_cast %55 : vector<1x16x256xbf16> to vector<16x256xbf16>
    %cst_42 = arith.constant dense<0.000000e+00> : vector<16x128xf32>
    %57 = tpu.matmul %56, %52, %cst_42 {dimension_numbers = #tpu.dot_dimension_numbers<[1], [0], [0], [1], [0, 0, 1, 1], [], []>} : vector<16x256xbf16>, vector<256x128xf32>, vector<16x128xf32> -> vector<16x128xf32>
    %58 = arith.addf %54, %57 : vector<16x128xf32>
    %c0_43 = arith.constant 0 : index
    %c0_44 = arith.constant 0 : index
    %c0_45 = arith.constant 0 : index
    %59 = vector.load %arg13[%c0_43, %c0_44, %c0_45] : memref<1x16x128xf32, #tpu.memory_space<vmem>>, vector<1x16x128xf32>
    %60 = vector.shape_cast %59 : vector<1x16x128xf32> to vector<16x128xf32>
    %61 = vector.shape_cast %58 : vector<16x128xf32> to vector<1x16x128xf32>
    tpu.vector_store %arg13[%c0_43, %c0_44, %c0_45], %61 {strides = array<i32>} : memref<1x16x128xf32, #tpu.memory_space<vmem>>, vector<1x16x128xf32>,
    return
  }
  func.func @transform_0(%arg0: i32, %arg1: i32) -> (i32, i32, i32) {
    %c0_i32 = arith.constant 0 : i32
    %c0_i32_0 = arith.constant 0 : i32
    %c0_i32_1 = arith.constant 0 : i32
    return %arg0, %c0_i32, %c0_i32_0 : i32, i32, i32
  }
  func.func @transform_1(%arg0: i32, %arg1: i32) -> (i32, i32, i32) {
    %c0_i32 = arith.constant 0 : i32
    %c0_i32_0 = arith.constant 0 : i32
    return %arg0, %arg1, %c0_i32 : i32, i32, i32
  }
  func.func @transform_2(%arg0: i32, %arg1: i32) -> (i32, i32, i32) {
    %c0_i32 = arith.constant 0 : i32
    %c0_i32_0 = arith.constant 0 : i32
    return %arg0, %arg1, %c0_i32 : i32, i32, i32
  }
  func.func @transform_3(%arg0: i32, %arg1: i32) -> (i32, i32, i32) {
    %c0_i32 = arith.constant 0 : i32
    %c0_i32_0 = arith.constant 0 : i32
    return %arg0, %c0_i32, %arg1 : i32, i32, i32
  }
  func.func @transform_4(%arg0: i32, %arg1: i32) -> (i32, i32, i32) {
    %c0_i32 = arith.constant 0 : i32
    %c0_i32_0 = arith.constant 0 : i32
    return %arg0, %arg1, %c0_i32 : i32, i32, i32
  }
  func.func @transform_5(%arg0: i32, %arg1: i32) -> (i32, i32, i32) {
    %c0_i32 = arith.constant 0 : i32
    %c0_i32_0 = arith.constant 0 : i32
    %c0_i32_1 = arith.constant 0 : i32
    return %arg0, %c0_i32, %c0_i32_0 : i32, i32, i32
  }
  func.func @transform_6(%arg0: i32, %arg1: i32) -> (i32, i32, i32) {
    %c0_i32 = arith.constant 0 : i32
    %c0_i32_0 = arith.constant 0 : i32
    %c0_i32_1 = arith.constant 0 : i32
    return %arg0, %c0_i32, %c0_i32_0 : i32, i32, i32
  }
  func.func @transform_7(%arg0: i32, %arg1: i32) -> (i32, i32, i32) {
    %c0_i32 = arith.constant 0 : i32
    %c0_i32_0 = arith.constant 0 : i32
    %c0_i32_1 = arith.constant 0 : i32
    return %arg0, %c0_i32, %c0_i32_0 : i32, i32, i32
  }
  func.func @transform_8(%arg0: i32, %arg1: i32) -> (i32, i32, i32) {
    %c0_i32 = arith.constant 0 : i32
    %c0_i32_0 = arith.constant 0 : i32
    %c0_i32_1 = arith.constant 0 : i32
    return %arg0, %c0_i32, %c0_i32_0 : i32, i32, i32
  }
  func.func @transform_9(%arg0: i32, %arg1: i32) -> (i32, i32, i32) {
    %c0_i32 = arith.constant 0 : i32
    %c0_i32_0 = arith.constant 0 : i32
    %c0_i32_1 = arith.constant 0 : i32
    return %arg0, %c0_i32, %c0_i32_0 : i32, i32, i32
  }
  func.func @transform_10(%arg0: i32, %arg1: i32) -> (i32, i32) {
    %c0_i32 = arith.constant 0 : i32
    %c0_i32_0 = arith.constant 0 : i32
    %c0_i32_1 = arith.constant 0 : i32
    return %c0_i32, %c0_i32_0 : i32, i32
  }
  func.func @transform_11(%arg0: i32, %arg1: i32) -> (i32, i32, i32) {
    %c0_i32 = arith.constant 0 : i32
    %c0_i32_0 = arith.constant 0 : i32
    %c0_i32_1 = arith.constant 0 : i32
    return %arg0, %c0_i32, %c0_i32_0 : i32, i32, i32
  }
}

</mosaic_0001>

<bundles_post_ra>
// kernel: tpu_custom_call.1
= control target key start
LH: loop header
LB: loop body
LE: loop exit
PB: predicated region body
PF: predicated region fallthrough
CT: control target
= control target key end

     0   :  { %s5962_s0 = inlined_call_operand.vmem [shape: f32[3,16,128], index: 0, kind: input, shape index: {}]   ;;  %s5963_s1 = inlined_call_operand.vmem [shape: bf16[3,256,16], index: 1, kind: input, shape index: {}]   ;;  %s5964_s2 = inlined_call_operand.vmem [shape: bf16[3,256,16], index: 2, kind: input, shape index: {}]   ;;  %s5965_s3 = inlined_call_operand.vmem [shape: bf16[3,16,256], index: 3, kind: input, shape index: {}]   ;;  %s5966_s4 = inlined_call_operand.vmem [shape: f32[3,256,128], index: 4, kind: input, shape index: {}]   ;;  %s5967_s5 = inlined_call_operand.vmem [shape: f32[3,128,5], index: 5, kind: input, shape index: {}]   ;;  %s5968_s6 = inlined_call_operand.vmem [shape: f32[3,128,5], index: 6, kind: input, shape index: {}]   ;;  %s5969_s7 = inlined_call_operand.vmem [shape: f32[3,1,5], index: 7, kind: input, shape index: {}]   ;;  %s5970_s8 = inlined_call_operand.vmem [shape: f32[3,128,5], index: 8, kind: input, shape index: {}]   ;;  %s5971_s9 = inlined_call_operand.vmem [shape: f32[3,1,5], index: 9, kind: input, shape index: {}]   ;;  %s5972_s10 = inlined_call_operand.vmem [shape: f32[5,128], index: 10, kind: input, shape index: {}]   ;;  %s5973_s11 = inlined_call_operand.hbm [shape: f32[3,16,128], index: 11, kind: output, shape index: {}]  }
   0x1   :  { %6044 = sst [smem:[#allocation63_spill]] %s5962_s0 }
   0x2   :  { %6045 = sst [smem:[#allocation64_spill]] %s5963_s1 }
   0x3   :  { %16 = vsyncpa [#allocation4], 0 }
   0x4   :  { %18 = vsyncpa [#allocation4 + $0x1], 0  ;;  %s4564_s17 = smov 0   ;;  %s4566_s18 = smov 0  }
   0x5   :  { %s4568_s19 = smov 0   ;;  %s4570_s20 = smov 0  }
   0x6   :  { %s4572_s21 = smov 0   ;;  %s4574_s22 = smov 0  }
   0x7 LB: > { %s3399_s23 = sadd.s32 4294967295, %s4499_s22   ;;  %s3400_s24 = sadd.s32 4294967294, %s4499_s22   ;;  %s4499_s22 = sphi %s4574_s22, %s24_s22   ;;  %s4495_s21 = sphi %s4572_s21, %s6193_s21   ;;  %s4491_s20 = sphi %s4570_s20, %s6192_s20   ;;  %s4487_s19 = sphi %s4568_s19, %s6191_s19   ;;  %s4483_s18 = sphi %s4566_s18, %s6190_s18   ;;  %s4479_s17 = sphi %s4564_s17, %s6189_s17  }
   0x8   : > { %s36_s25 = sadd.s32 1, %s4495_s21  ;;  %s332_s26 = sadd.s32 1, %s4487_s19 }
   0x9   : > { %p38_p0 = scmp.ge.s32.totalorder %s36_s25, 3  ;;  %p342_p1 = scmp.ne.s32.totalorder %s4487_s19, %s4483_s18 }
   0xa   : > { %p343_p2 = scmp.eq.s32.totalorder %s3399_s23, 2  ;;  %p348_p3 = scmp.ne.s32.totalorder %s4483_s18, %s4479_s17 }
   0xb   : > { %s6195_s25 = smov (%p38_p0, %s36_s25), 0  ;;  %p349_p5 = scmp.eq.s32.totalorder %s3400_s24, 2 }
   0xc   : > { %p4604_p4 = por %p343_p2, %p342_p1  ;;  %s329_s28 = ssub.s32 %s4495_s21, %s6195_s25 }
   0xd   : > { %p3403_p6 = scmp.ge.s32.totalorder %s4499_s22, 1  ;;  %p330_p7 = scmp.eq.s32.totalorder %s329_s28, 0 }
   0xe   : > { %p4611_p8 = por %p349_p5, %p348_p3  ;;  %p466_p9 = scmp.lt.s32.totalorder %s4499_s22, 4 }
   0xf   : > { %s4617_s30 = scalar_select %p330_p7, %s4487_s19, %s332_s26  }
  0x10   : > { %p467_p10 = pnand %p3403_p6, %p466_p9 }
  0x12   : > { %470 = sbr.rel (%p467_p10) target bundleno = 1396 (0x574), region = 64 }
  0x17   : > { %p563_p11 = scmp.lt.s32.totalorder %s4491_s20, 2  ;;  %s6048_s1 = sld [smem:[#allocation64_spill]]  ;;  %vm846_vm0 = vcmask 130048   ;;  %vm729_vm1 = vcmask 39936   ;;  %vm2837_vm2 = vcmask 1044480  }
  0x18   : > { %s6049_s0 = sld [smem:[#allocation63_spill]] }
  0x19   : > { %s4621_s12 = scalar_select %p563_p11, %s4491_s20, 2 }
  0x1b   : > { %s4624_s13 = sshll.u32 %s4621_s12, 7  ;;  %s5974_s28 = sshll.u32 %s4621_s12, 4 }
  0x1c   : > { %s4636_s26 = scalar_lea.vmem %s5967_s5, %s4624_s13  ;;  %s4679_s15 = scalar_lea.vmem %s5964_s2, %s4624_s13 }
  0x1d   : > { %s4630_s16 = scalar_lea.vmem %s6048_s1, %s4624_s13  ;;  %v653_v1 = vld [vmem:[%s4636_s26 + $0x78] sm:$0xff]  ;;  %v652_v2 = vld [vmem:[%s4636_s26 + $0x70] sm:$0xff]  ;;  %v651_v3 = vld [vmem:[%s4636_s26 + $0x68] sm:$0xff]  ;;  %s4729_s24 = scalar_lea.vmem %s5970_s8, %s4624_s13 }
  0x1e   : > { %v4132_v0 = vld [vmem:[%s4630_s16] sm:$0xff]   ;;  %3757 = vmatprep.subr.mxu0 %v653_v1  ;;  %s567_s23 = scalar_lea.vmem %s6049_s0, %s5974_s28  ;;  %v4133_v6 = vld [vmem:[%s4630_s16 + $0x8] sm:$0xff]   ;;  %v4134_v8 = vld [vmem:[%s4630_s16 + $0x10] sm:$0xff]   ;;  %s4689_s0 = scalar_lea.vmem %s5968_s6, %s4624_s13 }
  0x1f   : > { %3796 = vmatprep.mubr.msk.bf16.mxu1 %vm846_vm0, %v4132_v0  ;;  %3758 = vmatpush3.msra.mxu0 %v653_v1  ;;  %v4649_v4 = vld [vmem:[%s567_s23 + $0x8] sm:$0xff]  ;;  %v732_v5 = vld [vmem:[%s567_s23] sm:$0xff]  ;;  %v649_v9 = vld [vmem:[%s4636_s26 + $0x58] sm:$0xff] }
  0x20   : > { %3759 = vmatprep.subr.mxu0 %v652_v2  ;;  %3792 = vmatprep.subr.mxu1 %v4649_v4  ;;  %v650_v7 = vld [vmem:[%s4636_s26 + $0x60] sm:$0xff]  ;;  %v648_v10 = vld [vmem:[%s4636_s26 + $0x50] sm:$0xff]  ;;  %v647_v11 = vld [vmem:[%s4636_s26 + $0x48] sm:$0xff] }
  0x21   : > { %3760 = vmatpush3.msra.mxu0 %v652_v2  ;;  %3793 = vmatpush3.msra.mxu1 %v4649_v4  ;;  %v4135_v12 = vld [vmem:[%s4630_s16 + $0x18] sm:$0xff]   ;;  %v646_v13 = vld [vmem:[%s4636_s26 + $0x40] sm:$0xff]  ;;  %v644_v16 = vld [vmem:[%s4636_s26 + $0x30] sm:$0xff] }
  0x22   : > { %3761 = vmatprep.subr.mxu0 %v651_v3  ;;  %3794 = vmatprep.subr.mxu1 %v732_v5  ;;  %v4136_v14 = vld [vmem:[%s4630_s16 + $0x20] sm:$0xff]   ;;  %v645_v15 = vld [vmem:[%s4636_s26 + $0x38] sm:$0xff]  ;;  %v643_v17 = vld [vmem:[%s4636_s26 + $0x28] sm:$0xff] }
  0x23   : > { %3762 = vmatpush3.msra.mxu0 %v651_v3  ;;  %3795 = vmatpush3.msra.mxu1 %v732_v5  ;;  %v4137_v18 = vld [vmem:[%s4630_s16 + $0x28] sm:$0xff]   ;;  %v642_v19 = vld [vmem:[%s4636_s26 + $0x20] sm:$0xff]  ;;  %v4138_v20 = vld [vmem:[%s4630_s16 + $0x30] sm:$0xff]  }
  0x24   : > { %3763 = vmatprep.subr.mxu0 %v650_v7  ;;  %3797 = vmatmul.mubr.msk.bf16.vlgmr.msra.gmra.mxu1 %vm846_vm0, %v4133_v6  ;;  %v641_v21 = vld [vmem:[%s4636_s26 + $0x18] sm:$0xff]  ;;  %v640_v22 = vld [vmem:[%s4636_s26 + $0x10] sm:$0xff]  ;;  %v639_v23 = vld [vmem:[%s4636_s26 + $0x8] sm:$0xff] }
  0x25   : > { %3764 = vmatpush3.msra.mxu0 %v650_v7  ;;  %3800 = vmatprep.mubr.msk.bf16.mxu1 %vm846_vm0, %v4134_v8  ;;  %v4139_v24 = vld [vmem:[%s4630_s16 + $0x38] sm:$0xff]   ;;  %v638_v25 = vld [vmem:[%s4636_s26] sm:$0xff]  ;;  %v1136_v28 = vld [vmem:[%s4689_s0 + $0x70] sm:$0xff]  ;;  %s620_s26 = scalar_lea.vmem %s5969_s7, %s4621_s12 }
  0x26   : > { %3765 = vmatprep.subr.mxu0 %v649_v9  ;;  %3789 = vmatprep.mubr.f32.mxu0 %v732_v5  ;;  %v4140_v26 = vld [vmem:[%s4630_s16 + $0x40] sm:$0xff]   ;;  %v1137_v27 = vld [vmem:[%s4689_s0 + $0x78] sm:$0xff]  ;;  %v1135_v29 = vld [vmem:[%s4689_s0 + $0x68] sm:$0xff] }
  0x27   : > { %3766 = vmatpush3.msra.mxu0 %v649_v9  ;;  %v4141_v30 = vld [vmem:[%s4630_s16 + $0x48] sm:$0xff]   ;;  %v4142_v31 = vld [vmem:[%s4630_s16 + $0x50] sm:$0xff]   ;;  %v1134_v32 = vld [vmem:[%s4689_s0 + $0x60] sm:$0xff] }
  0x28   : > { %3767 = vmatprep.subr.mxu0 %v648_v10  ;;  %v1133_v33 = vld [vmem:[%s4689_s0 + $0x58] sm:$0xff]  ;;  %v1132_v34 = vld [vmem:[%s4689_s0 + $0x50] sm:$0xff]  ;;  %v1131_v35 = vld [vmem:[%s4689_s0 + $0x48] sm:$0xff] }
  0x29   : > { %3768 = vmatpush3.msra.mxu0 %v648_v10  ;;  %v4143_v36 = vld [vmem:[%s4630_s16 + $0x58] sm:$0xff]   ;;  %v4144_v37 = vld [vmem:[%s4630_s16 + $0x60] sm:$0xff]   ;;  %v1128_v40 = vld [vmem:[%s4689_s0 + $0x30] sm:$0xff] }
  0x2a   : > { %3769 = vmatprep.subr.mxu0 %v647_v11  ;;  %v1130_v38 = vld [vmem:[%s4689_s0 + $0x40] sm:$0xff]  ;;  %v1129_v39 = vld [vmem:[%s4689_s0 + $0x38] sm:$0xff]  ;;  %v1127_v41 = vld [vmem:[%s4689_s0 + $0x28] sm:$0xff] }
  0x2b   : > { %3770 = vmatpush3.msra.mxu0 %v647_v11  ;;  %v4145_v42 = vld [vmem:[%s4630_s16 + $0x68] sm:$0xff]   ;;  %v4146_v43 = vld [vmem:[%s4630_s16 + $0x70] sm:$0xff]   ;;  %v1126_v44 = vld [vmem:[%s4689_s0 + $0x20] sm:$0xff] }
  0x2c   : > { %3771 = vmatprep.subr.mxu0 %v646_v13  ;;  %3801 = vmatmul.mubr.msk.bf16.gmra.mxu1 %vm846_vm0, %v4135_v12  ;;  %v1125_v45 = vld [vmem:[%s4689_s0 + $0x18] sm:$0xff]  ;;  %v1124_v47 = vld [vmem:[%s4689_s0 + $0x10] sm:$0xff]  ;;  %v1123_v48 = vld [vmem:[%s4689_s0 + $0x8] sm:$0xff] }
  0x2d   : > { %3772 = vmatpush3.msra.mxu0 %v646_v13  ;;  %3804 = vmatprep.mubr.msk.bf16.mxu1 %vm846_vm0, %v4136_v14  ;;  %v4147_v46 = vld [vmem:[%s4630_s16 + $0x78] sm:$0xff]   ;;  %v1122_v49 = vld [vmem:[%s4689_s0] sm:$0xff]  ;;  %v1769_v56 = vld [vmem:[%s4729_s24 + $0x70] sm:$0xff]  ;;  %s3531_s0 = sshll.u32 %s4621_s12, 8 }
  0x2e   : > { %3773 = vmatprep.subr.mxu0 %v645_v15  ;;  %v1770_v50 = vld [vmem:[%s4729_s24 + $0x78] sm:$0xff]  ;;  %v4148_v51 = vld [vmem:[%s4679_s15] sm:$0xff]   ;;  %v1768_v58 = vld [vmem:[%s4729_s24 + $0x68] sm:$0xff]  ;;  %s4860_s14 = scalar_lea.vmem %s5966_s4, %s3531_s0  ;;  %s628_s0 = scalar_lea.vmem %s5971_s9, %s4621_s12 }
  0x2f   : > { %3774 = vmatpush3.msra.mxu0 %v645_v15  ;;  %v1767_v60 = vld [vmem:[%s4729_s24 + $0x60] sm:$0xff]  ;;  %v1766_v62 = vld [vmem:[%s4729_s24 + $0x58] sm:$0xff]  ;;  %v1765_v0 = vld [vmem:[%s4729_s24 + $0x50] sm:$0xff] }
  0x30   : > { %3775 = vmatprep.subr.mxu0 %v644_v16  ;;  %v1764_v2 = vld [vmem:[%s4729_s24 + $0x48] sm:$0xff]  ;;  %v1762_v6 = vld [vmem:[%s4729_s24 + $0x38] sm:$0xff]  ;;  %v1761_v8 = vld [vmem:[%s4729_s24 + $0x30] sm:$0xff] }
  0x31   : > { %3776 = vmatpush3.msra.mxu0 %v644_v16  ;;  %v1760_v10 = vld [vmem:[%s4729_s24 + $0x28] sm:$0xff]  ;;  %v1759_v13 = vld [vmem:[%s4729_s24 + $0x20] sm:$0xff]  ;;  %v1758_v16 = vld [vmem:[%s4729_s24 + $0x18] sm:$0xff] }
  0x32   : > { %3777 = vmatprep.subr.mxu0 %v643_v17 }
  0x33   : > { %3778 = vmatpush3.msra.mxu0 %v643_v17 }
  0x34   : > { %3779 = vmatprep.subr.mxu0 %v642_v19  ;;  %3805 = vmatmul.mubr.msk.bf16.gmra.mxu1 %vm846_vm0, %v4137_v18  ;;  %v1757_v18 = vld [vmem:[%s4729_s24 + $0x10] sm:$0xff] }
  0x35   : > { %3780 = vmatpush3.msra.mxu0 %v642_v19  ;;  %3808 = vmatprep.mubr.msk.bf16.mxu1 %vm846_vm0, %v4138_v20 }
  0x36   : > { %3781 = vmatprep.subr.mxu0 %v641_v21 }
  0x37   : > { %3782 = vmatpush3.msra.mxu0 %v641_v21 }
  0x38   : > { %3783 = vmatprep.subr.mxu0 %v640_v22 }
  0x39   : > { %3784 = vmatpush3.msra.mxu0 %v640_v22  ;;  %v4149_v22 = vld [vmem:[%s4679_s15 + $0x8] sm:$0xff]  }
  0x3a   : > { %3785 = vmatprep.subr.mxu0 %v639_v23 }
  0x3b   : > { %3786 = vmatpush3.msra.mxu0 %v639_v23  ;;  %v1756_v23 = vld [vmem:[%s4729_s24 + $0x8] sm:$0xff] }
  0x3c   : > { %3787 = vmatprep.subr.mxu0 %v638_v25  ;;  %3809 = vmatmul.mubr.msk.bf16.gmra.mxu1 %vm846_vm0, %v4139_v24 }
  0x3d   : > { %3788 = vmatpush3.msra.mxu0 %v638_v25  ;;  %3812 = vmatprep.mubr.msk.bf16.mxu1 %vm846_vm0, %v4140_v26  ;;  %v4150_v25 = vld [vmem:[%s4679_s15 + $0x10] sm:$0xff]  }
  0x3e   : > { %3790 = vmatmul.mubr.f32.vlgmr.msra.gmra.mxu0 %v4649_v4  ;;  %3828 = vmatprep.subr.mxu0 %v1137_v27  ;;  %v1763_v4 = vld [vmem:[%s4729_s24 + $0x40] sm:$0xff] }
  0x3f   : > { %3829 = vmatpush3.msra.mxu0 %v1137_v27  ;;  %v1755_v27 = vld [vmem:[%s4729_s24] sm:$0xff]  ;;  %s3535_s24 = sshll.u32 %s4491_s20, 8  ;;  %s4501_s20 = smov [#allocation3]  }
  0x40   : > { %3830 = vmatprep.subr.mxu0 %v1136_v28 }
  0x41   : > { %3831 = vmatpush3.msra.mxu0 %v1136_v28 }
  0x42   : > { %3832 = vmatprep.subr.mxu0 %v1135_v29 }
  0x43   : > { %3833 = vmatpush3.msra.mxu0 %v1135_v29 }
  0x44   : > { %3813 = vmatmul.mubr.msk.bf16.gmra.mxu1 %vm846_vm0, %v4141_v30  ;;  %3834 = vmatprep.subr.mxu0 %v1134_v32 }
  0x45   : > { %3816 = vmatprep.mubr.msk.bf16.mxu1 %vm846_vm0, %v4142_v31  ;;  %3835 = vmatpush3.msra.mxu0 %v1134_v32  ;;  %v4151_v31 = vld [vmem:[%s4679_s15 + $0x18] sm:$0xff]   ;;  %v4152_v32 = vld [vmem:[%s4679_s15 + $0x20] sm:$0xff]  }
  0x46   : > { %3836 = vmatprep.subr.mxu0 %v1133_v33 }
  0x47   : > { %3837 = vmatpush3.msra.mxu0 %v1133_v33 }
  0x48   : > { %3838 = vmatprep.subr.mxu0 %v1132_v34 }
  0x49   : > { %3839 = vmatpush3.msra.mxu0 %v1132_v34 }
  0x4a   : > { %3840 = vmatprep.subr.mxu0 %v1131_v35 }
  0x4b   : > { %3841 = vmatpush3.msra.mxu0 %v1131_v35 }
  0x4c   : > { %3817 = vmatmul.mubr.msk.bf16.gmra.mxu1 %vm846_vm0, %v4143_v36  ;;  %3842 = vmatprep.subr.mxu0 %v1130_v38 }
  0x4d   : > { %3820 = vmatprep.mubr.msk.bf16.mxu1 %vm846_vm0, %v4144_v37  ;;  %3843 = vmatpush3.msra.mxu0 %v1130_v38  ;;  %v4153_v37 = vld [vmem:[%s4679_s15 + $0x28] sm:$0xff]   ;;  %v4154_v38 = vld [vmem:[%s4679_s15 + $0x30] sm:$0xff]  }
  0x4e   : > { %3844 = vmatprep.subr.mxu0 %v1129_v39 }
  0x4f   : > { %3845 = vmatpush3.msra.mxu0 %v1129_v39 }
  0x50   : > { %3846 = vmatprep.subr.mxu0 %v1128_v40 }
  0x51   : > { %3847 = vmatpush3.msra.mxu0 %v1128_v40 }
  0x52   : > { %3848 = vmatprep.subr.mxu0 %v1127_v41 }
  0x53   : > { %3849 = vmatpush3.msra.mxu0 %v1127_v41 }
  0x54   : > { %3821 = vmatmul.mubr.msk.bf16.gmra.mxu1 %vm846_vm0, %v4145_v42  ;;  %3850 = vmatprep.subr.mxu0 %v1126_v44 }
  0x55   : > { %3824 = vmatprep.mubr.msk.bf16.mxu1 %vm846_vm0, %v4146_v43  ;;  %3851 = vmatpush3.msra.mxu0 %v1126_v44  ;;  %v4155_v43 = vld [vmem:[%s4679_s15 + $0x38] sm:$0xff]   ;;  %v4156_v44 = vld [vmem:[%s4679_s15 + $0x40] sm:$0xff]  }
  0x56   : > { %3852 = vmatprep.subr.mxu0 %v1125_v45 }
  0x57   : > { %3853 = vmatpush3.msra.mxu0 %v1125_v45 }
  0x58   : > { %3854 = vmatprep.subr.mxu0 %v1124_v47 }
  0x59   : > { %3855 = vmatpush3.msra.mxu0 %v1124_v47  ;;  %v1723_v47 = vld [vmem:[%s4860_s14] sm:$0xff] }
  0x5a   : > { %3856 = vmatprep.subr.mxu0 %v1123_v48 }
  0x5b   : > { %3857 = vmatpush3.msra.mxu0 %v1123_v48  ;;  %v4157_v48 = vld [vmem:[%s4679_s15 + $0x48] sm:$0xff]  }
  0x5c   : > { %3825 = vmatmul.mubr.msk.bf16.gmra.mxu1 %vm846_vm0, %v4147_v46  ;;  %3858 = vmatprep.subr.mxu0 %v1122_v49 }
  0x5d   : > { %3859 = vmatpush3.msra.mxu0 %v1122_v49  ;;  %3912 = vmatprep.mubr.msk.bf16.mxu1 %vm846_vm0, %v4148_v51  ;;  %v4158_v49 = vld [vmem:[%s4679_s15 + $0x50] sm:$0xff]  }
  0x5e   : > { %3944 = vmatprep.subr.mxu0 %v1770_v50  ;;  %v1725_v51 = vld [vmem:[%s4860_s14 + $0x10] sm:$0xff] }
  0xe4   : > { %v4734_v52 = vpop.f32.mrf.mxu1 }
  0xe5   : > { %6050 = vst [vmem:[#allocation6_spill] sm:$0xff] %v4734_v52 }
  0xe6   : > { %v4736_v53 = vpop.f32.mrf.mxu1 }
  0xe7   : > { %6051 = vst [vmem:[#allocation7_spill] sm:$0xff] %v4736_v53  ;;  %3860 = vmatprep.mubr.f32.mxu0 %v4736_v53 }
  0xe8   : > { %v4739_v54 = vpop.f32.mrf.mxu1 }
  0xe9   : > { %6052 = vst [vmem:[#allocation8_spill] sm:$0xff] %v4739_v54 }
  0xea   : > { %v4741_v55 = vpop.f32.mrf.mxu1 }
  0xeb   : > { %6053 = vst [vmem:[#allocation9_spill] sm:$0xff] %v4741_v55  ;;  %3861 = vmatmul.mubr.f32.vlgmr.msra.gmra.mxu0 %v4741_v55 }
  0xec   : > { %v4745_v57 = vpop.f32.mrf.mxu1  ;;  %3863 = vmatprep.mubr.f32.mxu0 %v4734_v52  ;;  %3945 = vmatpush3.msra.mxu0 %v1770_v50  ;;  %v1724_v50 = vld [vmem:[%s4860_s14 + $0x8] sm:$0xff] }
  0xed   : > { %6054 = vst [vmem:[#allocation10_spill] sm:$0xff] %v4745_v57  ;;  %3946 = vmatprep.subr.mxu0 %v1769_v56 }
  0xee   : > { %v4749_v59 = vpop.f32.mrf.mxu1  ;;  %3947 = vmatpush3.msra.mxu0 %v1769_v56  ;;  %v1726_v56 = vld [vmem:[%s4860_s14 + $0x18] sm:$0xff] }
  0xef   : > { %6055 = vst [vmem:[#allocation11_spill] sm:$0xff] %v4749_v59  ;;  %3864 = vmatmul.mubr.f32.gmra.mxu0 %v4739_v54  ;;  %3948 = vmatprep.subr.mxu0 %v1768_v58 }
  0xf0   : > { %v4753_v61 = vpop.f32.mrf.mxu1  ;;  %3866 = vmatprep.mubr.f32.mxu0 %v4749_v59  ;;  %3949 = vmatpush3.msra.mxu0 %v1768_v58  ;;  %v1727_v58 = vld [vmem:[%s4860_s14 + $0x20] sm:$0xff] }
  0xf1   : > { %6056 = vst [vmem:[#allocation12_spill] sm:$0xff] %v4753_v61  ;;  %3950 = vmatprep.subr.mxu0 %v1767_v60 }
  0xf2   : > { %v4757_v63 = vpop.f32.mrf.mxu1  ;;  %3951 = vmatpush3.msra.mxu0 %v1767_v60  ;;  %v4159_v60 = vld [vmem:[%s4679_s15 + $0x58] sm:$0xff]  }
  0xf3   : > { %6057 = vst [vmem:[#allocation13_spill] sm:$0xff] %v4757_v63  ;;  %3867 = vmatmul.mubr.f32.gmra.mxu0 %v4757_v63  ;;  %3952 = vmatprep.subr.mxu0 %v1766_v62 }
  0xf4   : > { %v4761_v1 = vpop.f32.mrf.mxu1  ;;  %3869 = vmatprep.mubr.f32.mxu0 %v4745_v57  ;;  %3953 = vmatpush3.msra.mxu0 %v1766_v62  ;;  %v4160_v62 = vld [vmem:[%s4679_s15 + $0x60] sm:$0xff]  }
  0xf5   : > { %6058 = vst [vmem:[#allocation14_spill] sm:$0xff] %v4761_v1  ;;  %3954 = vmatprep.subr.mxu0 %v1765_v0 }
  0xf6   : > { %v4765_v3 = vpop.f32.mrf.mxu1  ;;  %3955 = vmatpush3.msra.mxu0 %v1765_v0  ;;  %v1728_v0 = vld [vmem:[%s4860_s14 + $0x28] sm:$0xff] }
  0xf7   : > { %6059 = vst [vmem:[#allocation15_spill] sm:$0xff] %v4765_v3  ;;  %3870 = vmatmul.mubr.f32.gmra.mxu0 %v4753_v61  ;;  %3956 = vmatprep.subr.mxu0 %v1764_v2 }
  0xf8   : > { %v4769_v5 = vpop.f32.mrf.mxu1  ;;  %3872 = vmatprep.mubr.f32.mxu0 %v4765_v3  ;;  %3957 = vmatpush3.msra.mxu0 %v1764_v2  ;;  %v1729_v2 = vld [vmem:[%s4860_s14 + $0x30] sm:$0xff] }
  0xf9   : > { %6060 = vst [vmem:[#allocation16_spill] sm:$0xff] %v4769_v5  ;;  %3958 = vmatprep.subr.mxu0 %v1763_v4 }
  0xfa   : > { %v4773_v7 = vpop.f32.mrf.mxu1  ;;  %3959 = vmatpush3.msra.mxu0 %v1763_v4  ;;  %v1730_v4 = vld [vmem:[%s4860_s14 + $0x38] sm:$0xff] }
  0xfb   : > { %6061 = vst [vmem:[#allocation17_spill] sm:$0xff] %v4773_v7  ;;  %3873 = vmatmul.mubr.f32.gmra.mxu0 %v4773_v7  ;;  %3960 = vmatprep.subr.mxu0 %v1762_v6 }
  0xfc   : > { %v4777_v9 = vpop.f32.mrf.mxu1  ;;  %3875 = vmatprep.mubr.f32.mxu0 %v4761_v1  ;;  %3961 = vmatpush3.msra.mxu0 %v1762_v6  ;;  %v1731_v6 = vld [vmem:[%s4860_s14 + $0x40] sm:$0xff] }
  0xfd   : > { %6062 = vst [vmem:[#allocation18_spill] sm:$0xff] %v4777_v9  ;;  %3962 = vmatprep.subr.mxu0 %v1761_v8 }
  0xfe   : > { %v3791_v11 = vpop.f32.mrf.mxu0  ;;  %v4781_v12 = vpop.f32.mrf.mxu1  ;;  %3963 = vmatpush3.msra.mxu0 %v1761_v8  ;;  %v4161_v8 = vld [vmem:[%s4679_s15 + $0x68] sm:$0xff]  }
  0xff   : > { %6063 = vst [vmem:[#allocation19_spill] sm:$0xff] %v4781_v12  ;;  %731 = vst.msk [vmem:[#allocation2 + $0x8] sm:$0xff] %vm729_vm1, %v3791_v11  ;;  %3876 = vmatmul.mubr.f32.gmra.mxu0 %v4769_v5  ;;  %3964 = vmatprep.subr.mxu0 %v1760_v10  ;;  %v1732_v11 = vld [vmem:[%s4860_s14 + $0x48] sm:$0xff] }
 0x100   : > { %v720_v14 = vpop.f32.mrf.mxu0  ;;  %v4786_v15 = vpop.f32.mrf.mxu1  ;;  %3878 = vmatprep.mubr.f32.mxu0 %v4781_v12  ;;  %3965 = vmatpush3.msra.mxu0 %v1760_v10  ;;  %v4162_v10 = vld [vmem:[%s4679_s15 + $0x70] sm:$0xff]  }
 0x101   : > { %6064 = vst [vmem:[#allocation20_spill] sm:$0xff] %v4786_v15  ;;  %730 = vst.msk [vmem:[#allocation2] sm:$0xff] %vm729_vm1, %v720_v14  ;;  %3966 = vmatprep.subr.mxu0 %v1759_v13  ;;  %v1734_v14 = vld [vmem:[%s4860_s14 + $0x58] sm:$0xff] }
 0x102   : > { %v4791_v17 = vpop.f32.mrf.mxu1  ;;  %3967 = vmatpush3.msra.mxu0 %v1759_v13  ;;  %v1733_v13 = vld [vmem:[%s4860_s14 + $0x50] sm:$0xff] }
 0x103   : > { %6065 = vst [vmem:[#allocation21_spill] sm:$0xff] %v4791_v17  ;;  %3879 = vmatmul.mubr.f32.gmra.mxu0 %v4791_v17  ;;  %3968 = vmatprep.subr.mxu0 %v1758_v16 }
 0x104   : > { %v4795_v19 = vpop.f32.mrf.mxu1  ;;  %3881 = vmatprep.mubr.f32.mxu0 %v4777_v9  ;;  %3969 = vmatpush3.msra.mxu0 %v1758_v16  ;;  %v1735_v16 = vld [vmem:[%s4860_s14 + $0x60] sm:$0xff] }
 0x105   : > { %6066 = vst [vmem:[#allocation22_spill] sm:$0xff] %v4795_v19  ;;  %3970 = vmatprep.subr.mxu0 %v1757_v18 }
 0x106   : > { %v1121_v20 = vld [vmem:[#allocation2 + $0x8] sm:$0xff]  ;;  %v4798_v21 = vpop.f32.mrf.mxu1  ;;  %3971 = vmatpush3.msra.mxu0 %v1757_v18  ;;  %v4163_v18 = vld [vmem:[%s4679_s15 + $0x78] sm:$0xff]   ;;  %s5913_s15 = scalar_lea.hbm %s5973_s11, %s3535_s24 }
 0x107   : > { %6067 = vst [vmem:[#allocation23_spill] sm:$0xff] %v4798_v21  ;;  %3908 = vmatprep.subr.mxu1 %v1121_v20  ;;  %3882 = vmatmul.mubr.f32.gmra.mxu0 %v4786_v15 }
 0x108   : > { %3909 = vmatpush3.msra.mxu1 %v1121_v20  ;;  %v1120_v24 = vld [vmem:[#allocation2] sm:$0xff]  ;;  %v4804_v26 = vpop.f32.mrf.mxu1  ;;  %3884 = vmatprep.mubr.f32.mxu0 %v4798_v21  ;;  %v1736_v20 = vld [vmem:[%s4860_s14 + $0x68] sm:$0xff] }
 0x109   : > { %6068 = vst [vmem:[#allocation24_spill] sm:$0xff] %v4804_v26  ;;  %3910 = vmatprep.subr.mxu1 %v1120_v24  ;;  %3972 = vmatprep.subr.mxu0 %v1756_v23 }
 0x10a   : > { %3911 = vmatpush3.msra.mxu1 %v1120_v24  ;;  %v4808_v28 = vpop.f32.mrf.mxu1  ;;  %3973 = vmatpush3.msra.mxu0 %v1756_v23  ;;  %v1738_v23 = vld [vmem:[%s4860_s14 + $0x78] sm:$0xff]  ;;  %v1739_v24 = vld [vmem:[%s4860_s14 + $0x80] sm:$0xff] }
 0x10b   : > { %6069 = vst [vmem:[#allocation25_spill] sm:$0xff] %v4808_v28  ;;  %3913 = vmatmul.mubr.msk.bf16.vlgmr.msra.gmra.mxu1 %vm846_vm0, %v4149_v22  ;;  %3885 = vmatmul.mubr.f32.gmra.mxu0 %v4808_v28  ;;  %v1737_v22 = vld [vmem:[%s4860_s14 + $0x70] sm:$0xff] }
 0x10c   : > { %3916 = vmatprep.mubr.msk.bf16.mxu1 %vm846_vm0, %v4150_v25  ;;  %v4813_v29 = vpop.f32.mrf.mxu1  ;;  %3887 = vmatprep.mubr.f32.mxu0 %v4795_v19  ;;  %v1740_v25 = vld [vmem:[%s4860_s14 + $0x88] sm:$0xff] }
 0x10d   : > { %6070 = vst [vmem:[#allocation26_spill] sm:$0xff] %v4813_v29  ;;  %3974 = vmatprep.subr.mxu0 %v1755_v27 }
 0x10e   : > { %3975 = vmatpush3.msra.mxu0 %v1755_v27  ;;  %v4816_v30 = vpop.f32.mrf.mxu1  ;;  %v1741_v27 = vld [vmem:[%s4860_s14 + $0x90] sm:$0xff] }
 0x10f   : > { %6071 = vst [vmem:[#allocation27_spill] sm:$0xff] %v4816_v30  ;;  %3888 = vmatmul.mubr.f32.gmra.mxu0 %v4804_v26 }
 0x110   : > { %v4821_v33 = vpop.f32.mrf.mxu1  ;;  %3890 = vmatprep.mubr.f32.mxu0 %v4816_v30 }
 0x111   : > { %6072 = vst [vmem:[#allocation28_spill] sm:$0xff] %v4821_v33 }
 0x112   : > { %v4824_v34 = vpop.f32.mrf.mxu1 }
 0x113   : > { %6073 = vst [vmem:[#allocation29_spill] sm:$0xff] %v4824_v34  ;;  %3917 = vmatmul.mubr.msk.bf16.gmra.mxu1 %vm846_vm0, %v4151_v31  ;;  %3891 = vmatmul.mubr.f32.gmra.mxu0 %v4824_v34  ;;  %v1742_v31 = vld [vmem:[%s4860_s14 + $0x98] sm:$0xff] }
 0x114   : > { %3920 = vmatprep.mubr.msk.bf16.mxu1 %vm846_vm0, %v4152_v32  ;;  %v4829_v35 = vpop.f32.mrf.mxu1  ;;  %3893 = vmatprep.mubr.f32.mxu0 %v4813_v29  ;;  %v1743_v32 = vld [vmem:[%s4860_s14 + $0xa0] sm:$0xff] }
 0x115   : > { %6074 = vst [vmem:[#allocation30_spill] sm:$0xff] %v4829_v35 }
 0x116   : > { %v4832_v36 = vpop.f32.mrf.mxu1 }
 0x117   : > { %6075 = vst [vmem:[#allocation31_spill] sm:$0xff] %v4832_v36  ;;  %3894 = vmatmul.mubr.f32.gmra.mxu0 %v4821_v33 }
 0x118   : > { %v4837_v39 = vpop.f32.mrf.mxu1  ;;  %3896 = vmatprep.mubr.f32.mxu0 %v4832_v36 }
 0x119   : > { %6076 = vst [vmem:[#allocation32_spill] sm:$0xff] %v4837_v39 }
 0x11a   : > { %v4840_v40 = vpop.f32.mrf.mxu1 }
 0x11b   : > { %6077 = vst [vmem:[#allocation33_spill] sm:$0xff] %v4840_v40  ;;  %3921 = vmatmul.mubr.msk.bf16.gmra.mxu1 %vm846_vm0, %v4153_v37  ;;  %3897 = vmatmul.mubr.f32.gmra.mxu0 %v4840_v40  ;;  %v1744_v37 = vld [vmem:[%s4860_s14 + $0xa8] sm:$0xff] }
 0x11c   : > { %3924 = vmatprep.mubr.msk.bf16.mxu1 %vm846_vm0, %v4154_v38  ;;  %v4845_v41 = vpop.f32.mrf.mxu1  ;;  %3899 = vmatprep.mubr.f32.mxu0 %v4829_v35  ;;  %v1745_v38 = vld [vmem:[%s4860_s14 + $0xb0] sm:$0xff] }
 0x11d   : > { %6078 = vst [vmem:[#allocation34_spill] sm:$0xff] %v4845_v41 }
 0x11e   : > { %v4848_v42 = vpop.f32.mrf.mxu1 }
 0x11f   : > { %6079 = vst [vmem:[#allocation35_spill] sm:$0xff] %v4848_v42  ;;  %3900 = vmatmul.mubr.f32.gmra.mxu0 %v4837_v39 }
 0x120   : > { %v4854_v45 = vpop.f32.mrf.mxu1  ;;  %3902 = vmatprep.mubr.f32.mxu0 %v4848_v42 }
 0x121   : > { %6080 = vst [vmem:[#allocation36_spill] sm:$0xff] %v4854_v45 }
 0x122   : > { %v4862_v46 = vpop.f32.mrf.mxu1 }
 0x123   : > { %6081 = vst [vmem:[#allocation37_spill] sm:$0xff] %v4862_v46  ;;  %3925 = vmatmul.mubr.msk.bf16.gmra.mxu1 %vm846_vm0, %v4155_v43  ;;  %3903 = vmatmul.mubr.f32.gmra.mxu0 %v4862_v46  ;;  %v1746_v43 = vld [vmem:[%s4860_s14 + $0xb8] sm:$0xff] }
 0x124   : > { %3928 = vmatprep.mubr.msk.bf16.mxu1 %vm846_vm0, %v4156_v44  ;;  %3905 = vmatprep.mubr.f32.mxu0 %v4845_v41  ;;  %v1747_v44 = vld [vmem:[%s4860_s14 + $0xc0] sm:$0xff] }
 0x127   : > { %3906 = vmatmul.mubr.f32.gmra.mxu0 %v4854_v45 }
 0x128   : > { %3976 = vmatprep.mubr.f32.mxu0 %v1723_v47  ;;  %v1748_v47 = vld [vmem:[%s4860_s14 + $0xc8] sm:$0xff] }
 0x12b   : > { %3929 = vmatmul.mubr.msk.bf16.gmra.mxu1 %vm846_vm0, %v4157_v48  ;;  %3977 = vmatmul.mubr.f32.vlgmr.msra.gmra.mxu0 %v1724_v50  ;;  %v1749_v48 = vld [vmem:[%s4860_s14 + $0xd0] sm:$0xff]  ;;  %v1751_v50 = vld [vmem:[%s4860_s14 + $0xe0] sm:$0xff] }
 0x12c   : > { %3932 = vmatprep.mubr.msk.bf16.mxu1 %vm846_vm0, %v4158_v49  ;;  %3979 = vmatprep.mubr.f32.mxu0 %v1725_v51  ;;  %v1750_v49 = vld [vmem:[%s4860_s14 + $0xd8] sm:$0xff]  ;;  %v1752_v51 = vld [vmem:[%s4860_s14 + $0xe8] sm:$0xff] }
 0x12f   : > { %3980 = vmatmul.mubr.f32.gmra.mxu0 %v1726_v56  ;;  %v1753_v56 = vld [vmem:[%s4860_s14 + $0xf0] sm:$0xff] }
 0x130   : > { %3982 = vmatprep.mubr.f32.mxu0 %v1727_v58  ;;  %v1754_v58 = vld [vmem:[%s4860_s14 + $0xf8] sm:$0xff]  ;;  %s6156_s14 = sshll.u32 %s4621_s12, 4  ;;  %s560_s12 = sand.u32 1, %s4483_s18  }
 0x131   : > { %s3404_s28 = sshll.u32 %s560_s12, 4  ;;  %s5917_s23 = scalar_lea.sflag [#allocation4], %s560_s12 }
 0x133   : > { %3933 = vmatmul.mubr.msk.bf16.gmra.mxu1 %vm846_vm0, %v4159_v60  ;;  %3983 = vmatmul.mubr.f32.gmra.mxu0 %v1728_v0 }
 0x134   : > { %3936 = vmatprep.mubr.msk.bf16.mxu1 %vm846_vm0, %v4160_v62  ;;  %3985 = vmatprep.mubr.f32.mxu0 %v1729_v2 }
 0x137   : > { %3986 = vmatmul.mubr.f32.gmra.mxu0 %v1730_v4 }
 0x138   : > { %3988 = vmatprep.mubr.f32.mxu0 %v1731_v6 }
 0x13b   : > { %3937 = vmatmul.mubr.msk.bf16.gmra.mxu1 %vm846_vm0, %v4161_v8  ;;  %3989 = vmatmul.mubr.f32.gmra.mxu0 %v1732_v11 }
 0x13c   : > { %3940 = vmatprep.mubr.msk.bf16.mxu1 %vm846_vm0, %v4162_v10  ;;  %3991 = vmatprep.mubr.f32.mxu0 %v1733_v13 }
 0x13f   : > { %3992 = vmatmul.mubr.f32.gmra.mxu0 %v1734_v14 }
 0x140   : > { %3994 = vmatprep.mubr.f32.mxu0 %v1735_v16 }
 0x143   : > { %3941 = vmatmul.mubr.msk.bf16.gmra.mxu1 %vm846_vm0, %v4163_v18  ;;  %3995 = vmatmul.mubr.f32.gmra.mxu0 %v1736_v20 }
 0x144   : > { %3997 = vmatprep.mubr.f32.mxu0 %v1737_v22 }
 0x147   : > { %3998 = vmatmul.mubr.f32.gmra.mxu0 %v1738_v23 }
 0x148   : > { %4000 = vmatprep.mubr.f32.mxu0 %v1739_v24  ;;  %v4933_v24 = vld [vmem:[%s620_s26] ss:$0 sm:$0xff]  ;;  %s5845_s26 = scalar_lea.vmem %s5965_s3, %s6156_s14 }
 0x14b   : > { %4001 = vmatmul.mubr.f32.gmra.mxu0 %v1740_v25 }
 0x14c   : > { %4003 = vmatprep.mubr.f32.mxu0 %v1741_v27 }
 0x14f   : > { %4004 = vmatmul.mubr.f32.gmra.mxu0 %v1742_v31 }
 0x150   : > { %4006 = vmatprep.mubr.f32.mxu0 %v1743_v32 }
 0x153   : > { %4007 = vmatmul.mubr.f32.gmra.mxu0 %v1744_v37 }
 0x154   : > { %4009 = vmatprep.mubr.f32.mxu0 %v1745_v38 }
 0x157   : > { %4010 = vmatmul.mubr.f32.gmra.mxu0 %v1746_v43 }
 0x158   : > { %4012 = vmatprep.mubr.f32.mxu0 %v1747_v44 }
 0x15b   : > { %4013 = vmatmul.mubr.f32.gmra.mxu0 %v1748_v47 }
 0x15c   : > { %4015 = vmatprep.mubr.f32.mxu0 %v1749_v48 }
 0x15f   : > { %4016 = vmatmul.mubr.f32.gmra.mxu0 %v1750_v49 }
 0x160   : > { %4018 = vmatprep.mubr.f32.mxu0 %v1751_v50 }
 0x163   : > { %4019 = vmatmul.mubr.f32.gmra.mxu0 %v1752_v51 }
 0x164   : > { %4021 = vmatprep.mubr.f32.mxu0 %v1753_v56 }
 0x167   : > { %4022 = vmatmul.mubr.f32.gmra.mxu0 %v1754_v58 }
 0x1ab   : > { %v3862_v60 = vpop.f32.mrf.mxu0 }
 0x1ad   : > { %v1204_v62 = vpop.f32.mrf.mxu0 }
 0x1af   : > { %v3865_v0 = vpop.f32.mrf.mxu0 }
 0x1b1   : > { %v1214_v2 = vpop.f32.mrf.mxu0 }
 0x1b3   : > { %v3868_v4 = vpop.f32.mrf.mxu0 }
 0x1b5   : > { %v1224_v6 = vpop.f32.mrf.mxu0 }
 0x1b7   : > { %v3871_v8 = vpop.f32.mrf.mxu0 }
 0x1b9   : > { %v1234_v10 = vpop.f32.mrf.mxu0 }
 0x1bb   : > { %v4915_v11 = vpop.f32.mrf.mxu0 }
 0x1bd   : > { %v4917_v13 = vpop.f32.mrf.mxu0 }
 0x1bf   : > { %v4919_v14 = vpop.f32.mrf.mxu0 }
 0x1c1   : > { %v1254_v16 = vpop.f32.mrf.mxu0 }
 0x1c3   : > { %v4921_v18 = vpop.f32.mrf.mxu0 }
 0x1c5   : > { %v4923_v20 = vpop.f32.mrf.mxu0 }
 0x1c7   : > { %v4929_v22 = vpop.f32.mrf.mxu0 }
 0x1c9   : > { %v4931_v23 = vpop.f32.mrf.mxu0 }
 0x1cb   : > { %v3914_v25 = vpop.f32.mrf.mxu1  ;;  %v4935_v27 = vpop.f32.mrf.mxu0 }
 0x1cc   : > { %v1566_v31 = vadd.f32 %v3914_v25, %v1214_v2 }
 0x1cd   : > { %v1557_v32 = vpop.f32.mrf.mxu1  ;;  %v4937_v37 = vpop.f32.mrf.mxu0 }
 0x1ce   : > { %v1558_v38 = vadd.f32 %v1557_v32, %v1204_v62  ;;  %v4940_v43 = vadd.f32 %v4933_v24, %v1566_v31 }
 0x1cf   : > { %v3915_v44 = vpop.f32.mrf.mxu1  ;;  %v4942_v47 = vpop.f32.mrf.mxu0 }
 0x1d0   : > { %v1569_v48 = vadd.f32 %v3915_v44, %v3865_v0  ;;  %v2010_v49 = vsel %vm729_vm1, %v4940_v43, -inf  ;;  %v4947_v50 = vadd.f32 %v4933_v24, %v1558_v38 }
 0x1d1   : > { %2011 = vmax.xlane.f32.xlu0 %v2010_v49  ;;  %v1560_v51 = vpop.f32.mrf.mxu1  ;;  %v4949_v56 = vpop.f32.mrf.mxu0 }
 0x1d2   : > { %v1561_v58 = vadd.f32 %v3862_v60, %v1560_v51  ;;  %v2004_v25 = vsel %vm729_vm1, %v4947_v50, -inf  ;;  %v4959_v32 = vadd.f32 %v4933_v24, %v1569_v48 }
 0x1d3   : > { %v3918_v2 = vpop.f32.mrf.mxu1  ;;  %v4951_v62 = vpop.f32.mrf.mxu0 }
 0x1d4   : > { %v1582_v31 = vadd.f32 %v3918_v2, %v1234_v10  ;;  %v4956_v0 = vadd.f32 %v4933_v24, %v1561_v58  ;;  %v2013_v10 = vsel %vm729_vm1, %v4959_v32, -inf }
 0x1d5   : > { %2005 = vmax.xlane.f32.xlu0 %v2004_v25  ;;  %v1573_v38 = vpop.f32.mrf.mxu1  ;;  %v4961_v44 = vpop.f32.mrf.mxu0 }
 0x1d6   : > { %v2007_v60 = vsel %vm729_vm1, %v4956_v0, -inf  ;;  %v1574_v2 = vadd.f32 %v1573_v38, %v1224_v6  ;;  %v4970_v58 = vadd.f32 %v4933_v24, %v1582_v31 }
 0x1d7   : > { %2008 = vmax.xlane.f32.xlu1 %v2007_v60  ;;  %v3919_v49 = vpop.f32.mrf.mxu1  ;;  %v4965_v51 = vpop.f32.mrf.mxu0 }
 0x1d8   : > { %v1585_v55 = vadd.f32 %v3919_v49, %v3871_v8  ;;  %v2022_v60 = vsel %vm729_vm1, %v4970_v58, -inf  ;;  %v4979_v28 = vadd.f32 %v4933_v24, %v1574_v2 }
 0x1d9   : > { %2014 = vmax.xlane.f32.xlu0 %v2013_v10  ;;  %v1576_v48 = vpop.f32.mrf.mxu1  ;;  %v4972_v25 = vpop.f32.mrf.mxu0 }
 0x1da   : > { %v1577_v10 = vadd.f32 %v3868_v4, %v1576_v48  ;;  %v2016_v19 = vsel %vm729_vm1, %v4979_v28, -inf  ;;  %v4988_v8 = vadd.f32 %v4933_v24, %v1585_v55 }
 0x1db   : > { %v3922_v53 = vpop.f32.mrf.mxu1  ;;  %v4974_v21 = vpop.f32.mrf.mxu0 }
 0x1dc   : > { %v1598_v26 = vadd.f32 %v3922_v53, %v1254_v16  ;;  %v2025_v59 = vsel %vm729_vm1, %v4988_v8, -inf  ;;  %v4997_v30 = vadd.f32 %v4933_v24, %v1577_v10  ;;  %v5015_v10 = vld [vmem:[%s628_s0] ss:$0 sm:$0xff]  ;;  %s562_s0 = scalar_lea.vmem [#allocation3], %s3404_s28  ;;  %s4427_s28 = sshll.u32 %s4501_s20, 4  ;;  %s4428_s28 = int_to_ptr.vmem [resolvable:$false] %s4427_s28 }
 0x1dd   : > { %2023 = vmax.xlane.f32.xlu0 %v2022_v60  ;;  %v1589_v52 = vpop.f32.mrf.mxu1  ;;  %v4981_v6 = vpop.f32.mrf.mxu0  ;;  %s3203_s13 = sshll.u32 %s562_s0, 4  ;;  %s4429_s1 = scalar_lea.vmem %s4428_s28, 512  ;;  %s5915_s13 = int_to_ptr.vmem [resolvable:$true] %s3203_s13 }
 0x1de   : > { %v2019_v53 = vsel %vm729_vm1, %v4997_v30, -inf  ;;  %v5013_v16 = vadd.f32 %v4933_v24, %v1598_v26  ;;  %p4430_p1 = scmp.lt.s32.totalorder %s5915_s13, %s4428_s28 }
 0x1df   : > { %v3923_v31 = vpop.f32.mrf.mxu1  ;;  %v4983_v38 = vpop.f32.mrf.mxu0 }
 0x1e0   : > { %v2034_v61 = vsel %vm729_vm1, %v5013_v16, -inf }
 0x1e1   : > { %2017 = vmax.xlane.f32.xlu0 %v2016_v19  ;;  %v1592_v49 = vpop.f32.mrf.mxu1  ;;  %v4990_v54 = vpop.f32.mrf.mxu0  ;;  %v1590_v19 = vadd.f32 %v1589_v52, %v4917_v13  ;;  %v1601_v52 = vadd.f32 %v3923_v31, %v4919_v14 }
 0x1e2   : > { %v1593_v14 = vadd.f32 %v4915_v11, %v1592_v49 }
 0x1e3   : > { %v3926_v2 = vpop.f32.mrf.mxu1  ;;  %v4992_v60 = vpop.f32.mrf.mxu0  ;;  %v5026_v33 = vadd.f32 %v4933_v24, %v1590_v19 }
 0x1e4   : > { %v1614_v40 = vadd.f32 %v3926_v2, %v4931_v23 }
 0x1e5   : > { %2026 = vmax.xlane.f32.xlu0 %v2025_v59  ;;  %v1605_v4 = vpop.f32.mrf.mxu1  ;;  %v4999_v48 = vpop.f32.mrf.mxu0 }
 0x1e7   : > { %v5005_v55 = vpop.f32.mrf.mxu1  ;;  %v5008_v63 = vpop.f32.mrf.mxu0 }
 0x1e9   : > { %2020 = vmax.xlane.f32.xlu0 %v2019_v53  ;;  %v1608_v59 = vpop.f32.mrf.mxu1  ;;  %v5017_v34 = vpop.f32.mrf.mxu0 }
 0x1ea   : > { %v1609_v57 = vadd.f32 %v4921_v18, %v1608_v59 }
 0x1eb   : > { %v5020_v29 = vpop.f32.mrf.mxu1  ;;  %v3978_v13 = vpop.f32.mrf.mxu0 }
 0x1ec   : > { %v5029_v26 = vadd.f32 %v4933_v24, %v1609_v57  ;;  %v5032_v53 = vadd.f32 %v3978_v13, %v5015_v10  ;;  %v2028_v57 = vsel %vm729_vm1, %v5026_v33, -inf }
 0x1ed   : > { %2035 = vmax.xlane.f32.xlu0 %v2034_v61  ;;  %v1621_v3 = vpop.f32.mrf.mxu1  ;;  %v5034_v18 = vpop.f32.mrf.mxu0  ;;  %v5044_v61 = vadd.f32 %v4933_v24, %v1601_v52 }
 0x1ee   : > { %v1622_v59 = vadd.f32 %v1621_v3, %v4937_v37  ;;  %v2359_v31 = vsel %vm729_vm1, %v5032_v53, -inf }
 0x1ef   : > { %v3931_v36 = vpop.f32.mrf.mxu1  ;;  %v3981_v19 = vpop.f32.mrf.mxu0  ;;  %2360 = vmax.xlane.f32.xlu1 %v2359_v31 }
 0x1f0   : > { %v1633_v13 = vadd.f32 %v3931_v36, %v4942_v47  ;;  %v5047_v7 = vadd.f32 %v4933_v24, %v1622_v59  ;;  %v5050_v3 = vadd.f32 %v3981_v19, %v5015_v10  ;;  %v2037_v19 = vsel %vm729_vm1, %v5044_v61, -inf }
 0x1f1   : > { %2029 = vmax.xlane.f32.xlu0 %v2028_v57  ;;  %v1624_v11 = vpop.f32.mrf.mxu1  ;;  %v1854_v37 = vpop.f32.mrf.mxu0 }
 0x1f2   : > { %v1625_v49 = vadd.f32 %v4935_v27, %v1624_v11  ;;  %v5054_v31 = vadd.f32 %v4933_v24, %v1633_v13  ;;  %v5058_v36 = vadd.f32 %v5015_v10, %v1854_v37  ;;  %v2365_v47 = vsel %vm729_vm1, %v5050_v3, -inf }
 0x1f3   : > { %v3934_v52 = vpop.f32.mrf.mxu1  ;;  %2366 = vmax.xlane.f32.xlu1 %v2365_v47  ;;  %v3984_v59 = vpop.f32.mrf.mxu0  ;;  %v5066_v27 = vadd.f32 %v4933_v24, %v1593_v14 }
 0x1f4   : > { %v1646_v57 = vadd.f32 %v3934_v52, %v4972_v25  ;;  %v5069_v13 = vadd.f32 %v4933_v24, %v1625_v49  ;;  %v5072_v23 = vadd.f32 %v3984_v59, %v5015_v10  ;;  %v2362_v2 = vsel %vm729_vm1, %v5058_v36, -inf }
 0x1f5   : > { %2038 = vmax.xlane.f32.xlu0 %v2037_v19  ;;  %v1637_v11 = vpop.f32.mrf.mxu1  ;;  %v1864_v37 = vpop.f32.mrf.mxu0  ;;  %v1606_v25 = vadd.f32 %v1605_v4, %v4923_v20  ;;  %v2031_v49 = vsel %vm729_vm1, %v5066_v27, -inf  ;;  %v5085_v59 = vadd.f32 %v4933_v24, %v1614_v40  ;;  %v1617_v40 = vadd.f32 %v5005_v55, %v4929_v22 }
 0x1f6   : > { %v1638_v47 = vadd.f32 %v1637_v11, %v4961_v44  ;;  %v5078_v1 = vadd.f32 %v4933_v24, %v1646_v57  ;;  %v5091_v44 = vadd.f32 %v5015_v10, %v1864_v37  ;;  %v2371_v57 = vsel %vm729_vm1, %v5072_v23, -inf }
 0x1f7   : > { %v3935_v14 = vpop.f32.mrf.mxu1  ;;  %2363 = vmax.xlane.f32.xlu1 %v2362_v2  ;;  %v3987_v4 = vpop.f32.mrf.mxu0  ;;  %v2046_v37 = vsel %vm729_vm1, %v5085_v59, -inf }
 0x1f8   : > { %v1649_v52 = vadd.f32 %v3935_v14, %v4965_v51  ;;  %v5088_v19 = vadd.f32 %v4933_v24, %v1638_v47  ;;  %v5105_v14 = vadd.f32 %v4933_v24, %v1606_v25 }
 0x1f9   : > { %2032 = vmax.xlane.f32.xlu0 %v2031_v49  ;;  %v1640_v20 = vpop.f32.mrf.mxu1  ;;  %v1874_v55 = vpop.f32.mrf.mxu0 }
 0x1fa   : > { %v1641_v2 = vadd.f32 %v4951_v62, %v1640_v20  ;;  %v5097_v11 = vadd.f32 %v4933_v24, %v1649_v52  ;;  %v5111_v62 = vadd.f32 %v3987_v4, %v5015_v10  ;;  %v2368_v52 = vsel %vm729_vm1, %v5091_v44, -inf }
 0x1fb   : > { %v3938_v51 = vpop.f32.mrf.mxu1  ;;  %2372 = vmax.xlane.f32.xlu1 %v2371_v57  ;;  %v2040_v25 = vsel %vm729_vm1, %v5105_v14, -inf  ;;  %v5123_v4 = vadd.f32 %v4933_v24, %v1617_v40  ;;  %v5139_v40 = vadd.f32 %v5015_v10, %v5034_v18 }
 0x1fc   : > { %v1662_v47 = vadd.f32 %v3938_v51, %v4990_v54  ;;  %v5108_v49 = vadd.f32 %v4933_v24, %v1641_v2 }
 0x1fd   : > { %2047 = vmax.xlane.f32.xlu0 %v2046_v37  ;;  %v1653_v22 = vpop.f32.mrf.mxu1  ;;  %v5129_v37 = vadd.f32 %v5015_v10, %v1874_v55  ;;  %v2049_v55 = vsel %vm729_vm1, %v5123_v4, -inf }
 0x1fe   : > { %v1654_v57 = vadd.f32 %v1653_v22, %v4981_v6  ;;  %v5117_v20 = vadd.f32 %v4933_v24, %v1662_v47  ;;  %v2377_v6 = vsel %vm729_vm1, %v5111_v62, -inf }
 0x1ff   : > { %v3939_v54 = vpop.f32.mrf.mxu1  ;;  %2369 = vmax.xlane.f32.xlu1 %v2368_v52  ;;  %v3990_v52 = vpop.f32.mrf.mxu0 }
 0x200   : > { %v1665_v2 = vadd.f32 %v3939_v54, %v4983_v38  ;;  %v5126_v51 = vadd.f32 %v4933_v24, %v1654_v57 }
 0x201   : > { %2041 = vmax.xlane.f32.xlu0 %v2040_v25  ;;  %v1656_v47 = vpop.f32.mrf.mxu1  ;;  %v5148_v25 = vadd.f32 %v3990_v52, %v5015_v10  ;;  %v2356_v52 = vsel %vm729_vm1, %v5139_v40, -inf }
 0x202   : > { %v1657_v22 = vadd.f32 %v4974_v21, %v1656_v47  ;;  %v5135_v35 = vadd.f32 %v4933_v24, %v1665_v2  ;;  %v2374_v21 = vsel %vm729_vm1, %v5129_v37, -inf  ;;  %v1884_v47 = vpop.f32.mrf.mxu0 }
 0x203   : > { %v3942_v38 = vpop.f32.mrf.mxu1  ;;  %2378 = vmax.xlane.f32.xlu1 %v2377_v6 }
 0x204   : > { %v1678_v57 = vadd.f32 %v3942_v38, %v5017_v34  ;;  %v5145_v54 = vadd.f32 %v4933_v24, %v1657_v22  ;;  %v1630_v34 = vadd.f32 %v5020_v29, %v4949_v56 }
 0x205   : > { %2050 = vmax.xlane.f32.xlu0 %v2049_v55  ;;  %v1669_v2 = vpop.f32.mrf.mxu1  ;;  %v5165_v55 = vadd.f32 %v5015_v10, %v1884_v47 }
 0x206   : > { %v1670_v18 = vadd.f32 %v1669_v2, %v4999_v48  ;;  %v5154_v6 = vadd.f32 %v4933_v24, %v1678_v57  ;;  %v2383_v48 = vsel %vm729_vm1, %v5148_v25, -inf  ;;  %v3993_v2 = vpop.f32.mrf.mxu0 }
 0x207   : > { %v3943_v5 = vpop.f32.mrf.mxu1  ;;  %2375 = vmax.xlane.f32.xlu1 %v2374_v21  ;;  %v5182_v47 = vadd.f32 %v3993_v2, %v5015_v10 }
 0x208   : > { %v1681_v22 = vadd.f32 %v3943_v5, %v5008_v63  ;;  %v5162_v38 = vadd.f32 %v4933_v24, %v1670_v18  ;;  %v2043_v63 = vsel %vm729_vm1, %v5029_v26, -inf  ;;  %v5176_v5 = vadd.f32 %v4933_v24, %v1630_v34 }
 0x209   : > { %2357 = vmax.xlane.f32.xlu0 %v2356_v52  ;;  %v1672_v57 = vpop.f32.mrf.mxu1  ;;  %v2380_v18 = vsel %vm729_vm1, %v5165_v55, -inf  ;;  %v2389_v34 = vsel %vm729_vm1, %v5182_v47, -inf }
 0x20a   : > { %v1673_v29 = vadd.f32 %v4992_v60, %v1672_v57  ;;  %v5171_v56 = vadd.f32 %v4933_v24, %v1681_v22  ;;  %v1894_v60 = vpop.f32.mrf.mxu0  ;;  %v2058_v52 = vsel %vm729_vm1, %v5176_v5, -inf }
 0x20b   : > { %2384 = vmax.xlane.f32.xlu1 %v2383_v48  ;;  %v5189_v22 = vadd.f32 %v5015_v10, %v1894_v60  ;;  %v2052_v48 = vsel %vm729_vm1, %v5047_v7, -inf }
 0x20c   : > { %6082 = vst [vmem:[#allocation38_spill] sm:$0xff] %v5171_v56  ;;  %v5179_v21 = vadd.f32 %v4933_v24, %v1673_v29  ;;  %v3996_v24 = vpop.f32.mrf.mxu0 }
 0x20d   : > { %2044 = vmax.xlane.f32.xlu0 %v2043_v63  ;;  %v5196_v57 = vadd.f32 %v3996_v24, %v5015_v10  ;;  %v2386_v2 = vsel %vm729_vm1, %v5189_v22, -inf  ;;  %v2061_v63 = vsel %vm729_vm1, %v5054_v31, -inf }
 0x20e   : > { %6083 = vst [vmem:[#allocation39_spill] sm:$0xff] %v5179_v21  ;;  %v1904_v29 = vpop.f32.mrf.mxu0 }
 0x20f   : > { %2381 = vmax.xlane.f32.xlu1 %v2380_v18  ;;  %v5203_v18 = vadd.f32 %v5015_v10, %v1904_v29  ;;  %v2395_v60 = vsel %vm729_vm1, %v5196_v57, -inf  ;;  %v2070_v29 = vsel %vm729_vm1, %v5078_v1, -inf }
 0x211   : > { %2059 = vmax.xlane.f32.xlu0 %v2058_v52  ;;  %v3999_v52 = vpop.f32.mrf.mxu0 }
 0x212   : > { %v5210_v24 = vadd.f32 %v3999_v52, %v5015_v10  ;;  %v2064_v52 = vsel %vm729_vm1, %v5088_v19, -inf }
 0x213   : > { %2390 = vmax.xlane.f32.xlu1 %v2389_v34  ;;  %v2055_v34 = vsel %vm729_vm1, %v5069_v13, -inf }
 0x215   : > { %2053 = vmax.xlane.f32.xlu0 %v2052_v48  ;;  %v2392_v48 = vsel %vm729_vm1, %v5203_v18, -inf }
 0x217   : > { %2387 = vmax.xlane.f32.xlu1 %v2386_v2  ;;  %v1914_v2 = vpop.f32.mrf.mxu0 }
 0x218   : > { %v5217_v39 = vadd.f32 %v5015_v10, %v1914_v2  ;;  %v2073_v2 = vsel %vm729_vm1, %v5097_v11, -inf }
 0x219   : > { %2062 = vmax.xlane.f32.xlu0 %v2061_v63  ;;  %v2401_v63 = vsel %vm729_vm1, %v5210_v24, -inf }
 0x21b   : > { %2396 = vmax.xlane.f32.xlu1 %v2395_v60  ;;  %v4002_v60 = vpop.f32.mrf.mxu0 }
 0x21c   : > { %v5224_v12 = vadd.f32 %v4002_v60, %v5015_v10  ;;  %v2067_v60 = vsel %vm729_vm1, %v5108_v49, -inf }
 0x21d   : > { %2056 = vmax.xlane.f32.xlu0 %v2055_v34  ;;  %v2398_v34 = vsel %vm729_vm1, %v5217_v39, -inf }
 0x21f   : > { %2393 = vmax.xlane.f32.xlu1 %v2392_v48  ;;  %v1924_v48 = vpop.f32.mrf.mxu0 }
 0x220   : > { %v5231_v42 = vadd.f32 %v5015_v10, %v1924_v48  ;;  %v2082_v48 = vsel %vm729_vm1, %v5117_v20, -inf }
 0x221   : > { %2071 = vmax.xlane.f32.xlu0 %v2070_v29  ;;  %v2407_v29 = vsel %vm729_vm1, %v5224_v12, -inf }
 0x223   : > { %2402 = vmax.xlane.f32.xlu1 %v2401_v63  ;;  %v4005_v63 = vpop.f32.mrf.mxu0 }
 0x224   : > { %v5238_v17 = vadd.f32 %v4005_v63, %v5015_v10  ;;  %v2076_v63 = vsel %vm729_vm1, %v5126_v51, -inf }
 0x225   : > { %2065 = vmax.xlane.f32.xlu0 %v2064_v52  ;;  %v2404_v52 = vsel %vm729_vm1, %v5231_v42, -inf }
 0x227   : > { %2399 = vmax.xlane.f32.xlu1 %v2398_v34  ;;  %v1934_v34 = vpop.f32.mrf.mxu0 }
 0x228   : > { %v5245_v46 = vadd.f32 %v5015_v10, %v1934_v34  ;;  %v2085_v34 = vsel %vm729_vm1, %v5135_v35, -inf }
 0x229   : > { %2074 = vmax.xlane.f32.xlu0 %v2073_v2  ;;  %v2413_v2 = vsel %vm729_vm1, %v5238_v17, -inf }
 0x22a   : > { %6084 = vst [vmem:[#allocation40_spill] sm:$0xff] %v5245_v46 }
 0x22b   : > { %2408 = vmax.xlane.f32.xlu1 %v2407_v29  ;;  %v4008_v29 = vpop.f32.mrf.mxu0 }
 0x22c   : > { %v5252_v9 = vadd.f32 %v4008_v29, %v5015_v10  ;;  %v2079_v29 = vsel %vm729_vm1, %v5145_v54, -inf }
 0x22d   : > { %2068 = vmax.xlane.f32.xlu0 %v2067_v60  ;;  %v2410_v60 = vsel %vm729_vm1, %v5245_v46, -inf }
 0x22e   : > { %6085 = vst [vmem:[#allocation41_spill] sm:$0xff] %v5252_v9 }
 0x22f   : > { %2405 = vmax.xlane.f32.xlu1 %v2404_v52  ;;  %v1944_v52 = vpop.f32.mrf.mxu0 }
 0x230   : > { %v5259_v41 = vadd.f32 %v5015_v10, %v1944_v52  ;;  %v2094_v52 = vsel %vm729_vm1, %v5154_v6, -inf }
 0x231   : > { %2083 = vmax.xlane.f32.xlu0 %v2082_v48  ;;  %v2419_v48 = vsel %vm729_vm1, %v5252_v9, -inf }
 0x232   : > { %6086 = vst [vmem:[#allocation42_spill] sm:$0xff] %v5259_v41 }
 0x233   : > { %2414 = vmax.xlane.f32.xlu1 %v2413_v2  ;;  %v4011_v2 = vpop.f32.mrf.mxu0 }
 0x234   : > { %v5266_v15 = vadd.f32 %v4011_v2, %v5015_v10  ;;  %v2088_v2 = vsel %vm729_vm1, %v5162_v38, -inf }
 0x235   : > { %2077 = vmax.xlane.f32.xlu0 %v2076_v63  ;;  %v2416_v63 = vsel %vm729_vm1, %v5259_v41, -inf }
 0x236   : > { %6087 = vst [vmem:[#allocation43_spill] sm:$0xff] %v5266_v15 }
 0x237   : > { %2411 = vmax.xlane.f32.xlu1 %v2410_v60  ;;  %v1954_v60 = vpop.f32.mrf.mxu0 }
 0x238   : > { %v5273_v45 = vadd.f32 %v5015_v10, %v1954_v60  ;;  %v2097_v60 = vsel %vm729_vm1, %v5171_v56, -inf }
 0x239   : > { %2086 = vmax.xlane.f32.xlu0 %v2085_v34  ;;  %v2425_v34 = vsel %vm729_vm1, %v5266_v15, -inf }
 0x23a   : > { %6088 = vst [vmem:[#allocation44_spill] sm:$0xff] %v5273_v45 }
 0x23b   : > { %2420 = vmax.xlane.f32.xlu1 %v2419_v48  ;;  %v4014_v48 = vpop.f32.mrf.mxu0 }
 0x23c   : > { %v5280_v41 = vadd.f32 %v4014_v48, %v5015_v10  ;;  %v2091_v48 = vsel %vm729_vm1, %v5179_v21, -inf }
 0x23d   : > { %2080 = vmax.xlane.f32.xlu0 %v2079_v29  ;;  %v2422_v29 = vsel %vm729_vm1, %v5273_v45, -inf }
 0x23e   : > { %6089 = vst [vmem:[#allocation45_spill] sm:$0xff] %v5280_v41 }
 0x23f   : > { %2417 = vmax.xlane.f32.xlu1 %v2416_v63  ;;  %v1964_v63 = vpop.f32.mrf.mxu0 }
 0x240   : > { %v5287_v15 = vadd.f32 %v5015_v10, %v1964_v63 }
 0x241   : > { %2095 = vmax.xlane.f32.xlu0 %v2094_v52  ;;  %v2431_v52 = vsel %vm729_vm1, %v5280_v41, -inf }
 0x242   : > { %6090 = vst [vmem:[#allocation46_spill] sm:$0xff] %v5287_v15 }
 0x243   : > { %2426 = vmax.xlane.f32.xlu1 %v2425_v34  ;;  %v4017_v34 = vpop.f32.mrf.mxu0 }
 0x244   : > { %v5294_v45 = vadd.f32 %v4017_v34, %v5015_v10 }
 0x245   : > { %2089 = vmax.xlane.f32.xlu0 %v2088_v2  ;;  %v2428_v2 = vsel %vm729_vm1, %v5287_v15, -inf }
 0x246   : > { %6091 = vst [vmem:[#allocation47_spill] sm:$0xff] %v5294_v45 }
 0x247   : > { %2423 = vmax.xlane.f32.xlu1 %v2422_v29  ;;  %v1974_v29 = vpop.f32.mrf.mxu0 }
 0x248   : > { %v5299_v63 = vadd.f32 %v5015_v10, %v1974_v29 }
 0x249   : > { %2098 = vmax.xlane.f32.xlu0 %v2097_v60  ;;  %v2437_v60 = vsel %vm729_vm1, %v5294_v45, -inf  ;;  %v4020_v41 = vpop.f32.mrf.mxu0 }
 0x24a   : > { %6092 = vst [vmem:[#allocation48_spill] sm:$0xff] %v5299_v63  ;;  %v2434_v34 = vsel %vm729_vm1, %v5299_v63, -inf }
 0x24b   : > { %2432 = vmax.xlane.f32.xlu1 %v2431_v52  ;;  %v5304_v52 = vadd.f32 %v4020_v41, %v5015_v10  ;;  %v1984_v9 = vpop.f32.mrf.mxu0 }
 0x24d   : > { %2092 = vmax.xlane.f32.xlu0 %v2091_v48  ;;  %6093 = vst [vmem:[#allocation49_spill] sm:$0xff] %v5304_v52  ;;  %v5309_v48 = vadd.f32 %v5015_v10, %v1984_v9  ;;  %v4023_v15 = vpop.f32.mrf.mxu0 }
 0x24e   : > { %v5315_v41 = vadd.f32 %v4023_v15, %v5015_v10 }
 0x24f   : > { %2429 = vmax.xlane.f32.xlu1 %v2428_v2  ;;  %v2443_v2 = vsel %vm729_vm1, %v5304_v52, -inf  ;;  %v2440_v63 = vsel %vm729_vm1, %v5309_v48, -inf }
 0x250   : > { %v2449_v15 = vsel %vm729_vm1, %v5315_v41, -inf }
 0x253   : > { %2438 = vmax.xlane.f32.xlu1 %v2437_v60 }
 0x257   : > { %2435 = vmax.xlane.f32.xlu1 %v2434_v34  ;;  %v1994_v34 = vpop.f32.mrf.mxu0 }
 0x25a   : > { %v2012_v29 = vpop.xlane.xlu0 %2011 }
 0x25b   : > { %v2102_v45 = vsub.f32 %v4940_v43, %v2012_v29  ;;  %2444 = vmax.xlane.f32.xlu1 %v2443_v2  ;;  %v5322_v43 = vadd.f32 %v5015_v10, %v1994_v34 }
 0x25d   : > { %v2136_v60 = vmul.f32 1.442695, %v2102_v45 }
 0x25e   : > { %v2006_v21 = vpop.xlane.xlu0 %2005 }
 0x25f   : > { %4167 = vpow2.f32 %v2136_v60  ;;  %v2100_v9 = vsub.f32 %v4947_v50, %v2006_v21  ;;  %2441 = vmax.xlane.f32.xlu1 %v2440_v63  ;;  %v2446_v50 = vsel %vm729_vm1, %v5322_v43, -inf }
 0x260   : > { %v2009_v56 = vpop.xlane.xlu1 %2008 }
 0x261   : > { %v2132_v52 = vmul.f32 1.442695, %v2100_v9  ;;  %v2101_v46 = vsub.f32 %v4956_v0, %v2009_v56 }
 0x262   : > { %v2015_v45 = vpop.xlane.xlu0 %2014 }
 0x263   : > { %4169 = vpow2.f32 %v2132_v52  ;;  %v2103_v2 = vsub.f32 %v4959_v32, %v2015_v45  ;;  %2450 = vmax.xlane.f32.xlu1 %v2449_v15  ;;  %v2134_v29 = vmul.f32 1.442695, %v2101_v46 }
 0x265   : > { %v2138_v60 = vmul.f32 1.442695, %v2103_v2 }
 0x266   : > { %v2024_v21 = vpop.xlane.xlu0 %2023 }
 0x267   : > { %4171 = vpow2.f32 %v2138_v60  ;;  %v2106_v0 = vsub.f32 %v4970_v58, %v2024_v21  ;;  %2447 = vmax.xlane.f32.xlu1 %v2446_v50 }
 0x268   : > { %4173 = vpow2.f32 %v2134_v29 }
 0x269   : > { %v2144_v10 = vmul.f32 1.442695, %v2106_v0 }
 0x26a   : > { %v2018_v56 = vpop.xlane.xlu0 %2017 }
 0x26b   : > { %v2104_v63 = vsub.f32 %v4979_v28, %v2018_v56  ;;  %4175 = vpow2.f32 %v2144_v10 }
 0x26c   : > { %v5331_v34 = vpop.eup %4167 }
 0x26d   : > { %v2140_v32 = vmul.f32 1.442695, %v2104_v63  ;;  %v2202_v46 = vsel %vm729_vm1, %v5331_v34, 0.0 }
 0x26e   : > { %2203 = vadd.xlane.f32.xlu0 %v2202_v46  ;;  %v2027_v52 = vpop.xlane.xlu0 %2026 }
 0x26f   : > { %v2107_v9 = vsub.f32 %v4988_v8, %v2027_v52  ;;  %4177 = vpow2.f32 %v2140_v32 }
 0x270   : > { %v5336_v15 = vpop.eup %4169 }
 0x271   : > { %v2146_v58 = vmul.f32 1.442695, %v2107_v9  ;;  %v2196_v45 = vsel %vm729_vm1, %v5336_v15, 0.0 }
 0x272   : > { %2197 = vadd.xlane.f32.xlu0 %v2196_v45  ;;  %v2021_v28 = vpop.xlane.xlu0 %2020 }
 0x273   : > { %v2105_v2 = vsub.f32 %v4997_v30, %v2021_v28  ;;  %4179 = vpow2.f32 %v2146_v58 }
 0x274   : > { %v5341_v29 = vpop.eup %4171 }
 0x275   : > { %v2142_v60 = vmul.f32 1.442695, %v2105_v2  ;;  %v2205_v50 = vsel %vm729_vm1, %v5341_v29, 0.0  ;;  %v5345_v21 = vpop.eup %4173 }
 0x276   : > { %2206 = vadd.xlane.f32.xlu0 %v2205_v50  ;;  %v2036_v8 = vpop.xlane.xlu0 %2035  ;;  %v2199_v63 = vsel %vm729_vm1, %v5345_v21, 0.0 }
 0x277   : > { %v2110_v0 = vsub.f32 %v5013_v16, %v2036_v8  ;;  %4181 = vpow2.f32 %v2142_v60 }
 0x278   : > { %v2361_v10 = vpop.xlane.xlu1 %2360  ;;  %v5350_v30 = vpop.eup %4175 }
 0x279   : > { %v2152_v56 = vmul.f32 1.442695, %v2110_v0  ;;  %v2453_v32 = vsub.f32 %v5032_v53, %v2361_v10  ;;  %v2214_v16 = vsel %vm729_vm1, %v5350_v30, 0.0 }
 0x27a   : > { %2200 = vadd.xlane.f32.xlu0 %v2199_v63  ;;  %v2030_v46 = vpop.xlane.xlu0 %2029 }
 0x27b   : > { %v2108_v52 = vsub.f32 %v5026_v33, %v2030_v46  ;;  %v2486_v9 = vmul.f32 1.442695, %v2453_v32  ;;  %4183 = vpow2.f32 %v2152_v56 }
 0x27c   : > { %v2367_v58 = vpop.xlane.xlu1 %2366  ;;  %v5356_v28 = vpop.eup %4177 }
 0x27d   : > { %v2148_v45 = vmul.f32 1.442695, %v2108_v52  ;;  %4185 = vpow2.f32 %v2486_v9  ;;  %v2208_v33 = vsel %vm729_vm1, %v5356_v28, 0.0 }
 0x27e   : > { %2215 = vadd.xlane.f32.xlu0 %v2214_v16  ;;  %v2039_v2 = vpop.xlane.xlu0 %2038 }
 0x27f   : > { %v2111_v60 = vsub.f32 %v5044_v61, %v2039_v2  ;;  %4187 = vpow2.f32 %v2148_v45 }
 0x280   : > { %v2364_v53 = vpop.xlane.xlu1 %2363  ;;  %v5361_v8 = vpop.eup %4179 }
 0x281   : > { %v2154_v50 = vmul.f32 1.442695, %v2111_v60  ;;  %v2217_v32 = vsel %vm729_vm1, %v5361_v8, 0.0 }
 0x282   : > { %2209 = vadd.xlane.f32.xlu0 %v2208_v33  ;;  %v2033_v0 = vpop.xlane.xlu0 %2032 }
 0x283   : > { %v2109_v10 = vsub.f32 %v5066_v27, %v2033_v0  ;;  %4189 = vpow2.f32 %v2154_v50 }
 0x284   : > { %v2373_v56 = vpop.xlane.xlu1 %2372  ;;  %v5366_v46 = vpop.eup %4181 }
 0x285   : > { %v2150_v63 = vmul.f32 1.442695, %v2109_v10  ;;  %v2211_v16 = vsel %vm729_vm1, %v5366_v46, 0.0 }
 0x286   : > { %2218 = vadd.xlane.f32.xlu0 %v2217_v32  ;;  %v2048_v61 = vpop.xlane.xlu0 %2047 }
 0x287   : > { %v2114_v52 = vsub.f32 %v5085_v59, %v2048_v61  ;;  %4191 = vpow2.f32 %v2150_v63 }
 0x288   : > { %v2370_v9 = vpop.xlane.xlu1 %2369  ;;  %v5371_v2 = vpop.eup %4183 }
 0x289   : > { %v2160_v45 = vmul.f32 1.442695, %v2114_v52  ;;  %6094 = vst [vmem:[#allocation50_spill] sm:$0xff] %v5371_v2  ;;  %v2226_v10 = vsel %vm729_vm1, %v5371_v2, 0.0  ;;  %v2455_v52 = vsub.f32 %v5050_v3, %v2367_v58 }
 0x28a   : > { %2212 = vadd.xlane.f32.xlu0 %v2211_v16  ;;  %v2042_v27 = vpop.xlane.xlu0 %2041  ;;  %v5373_v60 = vpop.eup %4185 }
 0x28b   : > { %v2112_v50 = vsub.f32 %v5105_v14, %v2042_v27  ;;  %v2551_v33 = vsel %vm729_vm1, %v5373_v60, 0.0  ;;  %4193 = vpow2.f32 %v2160_v45  ;;  %v2490_v2 = vmul.f32 1.442695, %v2455_v52 }
 0x28c   : > { %2552 = vadd.xlane.f32.xlu1 %v2551_v33  ;;  %v2379_v59 = vpop.xlane.xlu1 %2378  ;;  %v5380_v63 = vpop.eup %4187 }
 0x28d   : > { %v2156_v0 = vmul.f32 1.442695, %v2112_v50  ;;  %v2220_v45 = vsel %vm729_vm1, %v5380_v63, 0.0 }
 0x28e   : > { %2227 = vadd.xlane.f32.xlu0 %v2226_v10  ;;  %v2051_v32 = vpop.xlane.xlu0 %2050  ;;  %v2454_v10 = vsub.f32 %v5058_v36, %v2364_v53 }
 0x28f   : > { %v2115_v61 = vsub.f32 %v5123_v4, %v2051_v32  ;;  %4195 = vpow2.f32 %v2156_v0 }
 0x290   : > { %v5384_v14 = vpop.xlane.xlu1 %2375  ;;  %v5388_v27 = vpop.eup %4189 }
 0x291   : > { %v2162_v16 = vmul.f32 1.442695, %v2115_v61  ;;  %v2229_v58 = vsel %vm729_vm1, %v5388_v27, 0.0 }
 0x292   : > { %2221 = vadd.xlane.f32.xlu0 %v2220_v45  ;;  %v2358_v50 = vpop.xlane.xlu0 %2357  ;;  %v2488_v45 = vmul.f32 1.442695, %v2454_v10 }
 0x293   : > { %v2452_v33 = vsub.f32 %v5139_v40, %v2358_v50  ;;  %4197 = vpow2.f32 %v2162_v16  ;;  %v2457_v40 = vsub.f32 %v5072_v23, %v2373_v56 }
 0x294   : > { %v5392_v4 = vpop.xlane.xlu1 %2384  ;;  %v5396_v0 = vpop.eup %4191 }
 0x295   : > { %v2484_v3 = vmul.f32 1.442695, %v2452_v33  ;;  %v2223_v53 = vsel %vm729_vm1, %v5396_v0, 0.0 }
 0x296   : > { %2230 = vadd.xlane.f32.xlu0 %v2229_v58  ;;  %v2045_v32 = vpop.xlane.xlu0 %2044 }
 0x297   : > { %4199 = vpow2.f32 %v2484_v3  ;;  %v2113_v61 = vsub.f32 %v5029_v26, %v2045_v32  ;;  %v2456_v3 = vsub.f32 %v5091_v44, %v2370_v9  ;;  %v2494_v26 = vmul.f32 1.442695, %v2457_v40 }
 0x298   : > { %4201 = vpow2.f32 %v2490_v2  ;;  %v5400_v52 = vpop.xlane.xlu1 %2381  ;;  %v5404_v16 = vpop.eup %4193 }
 0x299   : > { %v2158_v36 = vmul.f32 1.442695, %v2113_v61  ;;  %v2238_v56 = vsel %vm729_vm1, %v5404_v16, 0.0  ;;  %v2492_v61 = vmul.f32 1.442695, %v2456_v3 }
 0x29a   : > { %2224 = vadd.xlane.f32.xlu0 %v2223_v53  ;;  %v2060_v50 = vpop.xlane.xlu0 %2059 }
 0x29b   : > { %4203 = vpow2.f32 %v2158_v36  ;;  %v2118_v33 = vsub.f32 %v5176_v5, %v2060_v50  ;;  %v2459_v5 = vsub.f32 %v5111_v62, %v2379_v59  ;;  %v2458_v62 = vsub.f32 %v5129_v37, %v5384_v14 }
 0x29c   : > { %4205 = vpow2.f32 %v2488_v45  ;;  %v5408_v2 = vpop.xlane.xlu1 %2390  ;;  %v5412_v10 = vpop.eup %4195  ;;  %v2461_v14 = vsub.f32 %v5148_v25, %v5392_v4  ;;  %v2460_v4 = vsub.f32 %v5165_v55, %v5400_v52 }
 0x29d   : > { %v2168_v23 = vmul.f32 1.442695, %v2118_v33  ;;  %v2232_v45 = vsel %vm729_vm1, %v5412_v10, 0.0  ;;  %v2496_v37 = vmul.f32 1.442695, %v2458_v62  ;;  %v2463_v55 = vsub.f32 %v5182_v47, %v5408_v2 }
 0x29e   : > { %2239 = vadd.xlane.f32.xlu0 %v2238_v56  ;;  %v2054_v58 = vpop.xlane.xlu0 %2053  ;;  %v2502_v25 = vmul.f32 1.442695, %v2461_v14 }
 0x29f   : > { %4207 = vpow2.f32 %v2168_v23  ;;  %v2116_v32 = vsub.f32 %v5047_v7, %v2054_v58  ;;  %v2498_v7 = vmul.f32 1.442695, %v2459_v5  ;;  %v2506_v47 = vmul.f32 1.442695, %v2463_v55 }
 0x2a0   : > { %4209 = vpow2.f32 %v2494_v26  ;;  %v5416_v44 = vpop.xlane.xlu1 %2387  ;;  %v5420_v40 = vpop.eup %4197 }
 0x2a1   : > { %v2164_v9 = vmul.f32 1.442695, %v2116_v32  ;;  %v2241_v26 = vsel %vm729_vm1, %v5420_v40, 0.0 }
 0x2a2   : > { %2233 = vadd.xlane.f32.xlu0 %v2232_v45  ;;  %v2063_v36 = vpop.xlane.xlu0 %2062 }
 0x2a3   : > { %4211 = vpow2.f32 %v2164_v9  ;;  %v2119_v53 = vsub.f32 %v5054_v31, %v2063_v36 }
 0x2a4   : > { %v5423_v50 = vpop.eup %4199  ;;  %4213 = vpow2.f32 %v2492_v61  ;;  %v5429_v33 = vpop.xlane.xlu1 %2396 }
 0x2a5   : > { %v5427_v59 = vpop.eup %4201  ;;  %v2170_v3 = vmul.f32 1.442695, %v2119_v53  ;;  %v2548_v23 = vsel %vm729_vm1, %v5423_v50, 0.0 }
 0x2a6   : > { %2242 = vadd.xlane.f32.xlu0 %v2241_v26  ;;  %2549 = vadd.xlane.f32.xlu1 %v2548_v23  ;;  %v2057_v31 = vpop.xlane.xlu0 %2056  ;;  %v2557_v5 = vsel %vm729_vm1, %v5427_v59, 0.0 }
 0x2a7   : > { %4215 = vpow2.f32 %v2170_v3  ;;  %v2117_v56 = vsub.f32 %v5069_v13, %v2057_v31 }
 0x2a8   : > { %v5436_v58 = vpop.eup %4203  ;;  %4217 = vpow2.f32 %v2498_v7  ;;  %v5440_v32 = vpop.xlane.xlu1 %2393 }
 0x2a9   : > { %v2166_v61 = vmul.f32 1.442695, %v2117_v56  ;;  %v2235_v9 = vsel %vm729_vm1, %v5436_v58, 0.0  ;;  %v5446_v45 = vpop.eup %4205 }
 0x2aa   : > { %2558 = vadd.xlane.f32.xlu1 %v2557_v5  ;;  %2236 = vadd.xlane.f32.xlu0 %v2235_v9  ;;  %v2072_v13 = vpop.xlane.xlu0 %2071  ;;  %v2554_v3 = vsel %vm729_vm1, %v5446_v45, 0.0 }
 0x2ab   : > { %4219 = vpow2.f32 %v2166_v61  ;;  %v2122_v36 = vsub.f32 %v5078_v1, %v2072_v13 }
 0x2ac   : > { %v5449_v53 = vpop.eup %4207  ;;  %4221 = vpow2.f32 %v2496_v37  ;;  %v5453_v7 = vpop.xlane.xlu1 %2402  ;;  %v2500_v37 = vmul.f32 1.442695, %v2460_v4  ;;  %v2462_v4 = vsub.f32 %v5189_v22, %v5416_v44  ;;  %v2465_v44 = vsub.f32 %v5196_v57, %v5429_v33 }
 0x2ad   : > { %v2176_v62 = vmul.f32 1.442695, %v2122_v36  ;;  %v2250_v26 = vsel %vm729_vm1, %v5449_v53, 0.0  ;;  %v5459_v23 = vpop.eup %4209 }
 0x2ae   : > { %2555 = vadd.xlane.f32.xlu1 %v2554_v3  ;;  %2251 = vadd.xlane.f32.xlu0 %v2250_v26  ;;  %v2066_v1 = vpop.xlane.xlu0 %2065  ;;  %v2563_v5 = vsel %vm729_vm1, %v5459_v23, 0.0  ;;  %v2504_v22 = vmul.f32 1.442695, %v2462_v4 }
 0x2af   : > { %4223 = vpow2.f32 %v2176_v62  ;;  %v2120_v31 = vsub.f32 %v5088_v19, %v2066_v1 }
 0x2b0   : > { %v5462_v56 = vpop.eup %4211  ;;  %4225 = vpow2.f32 %v2502_v25  ;;  %v5468_v14 = vpop.xlane.xlu1 %2399 }
 0x2b1   : > { %v5466_v52 = vpop.eup %4213  ;;  %v2172_v61 = vmul.f32 1.442695, %v2120_v31  ;;  %v2244_v9 = vsel %vm729_vm1, %v5462_v56, 0.0 }
 0x2b2   : > { %2564 = vadd.xlane.f32.xlu1 %v2563_v5  ;;  %2245 = vadd.xlane.f32.xlu0 %v2244_v9  ;;  %v2075_v19 = vpop.xlane.xlu0 %2074  ;;  %v2560_v2 = vsel %vm729_vm1, %v5466_v52, 0.0 }
 0x2b3   : > { %4227 = vpow2.f32 %v2172_v61  ;;  %v2123_v13 = vsub.f32 %v5097_v11, %v2075_v19 }
 0x2b4   : > { %v5475_v36 = vpop.eup %4215  ;;  %4229 = vpow2.f32 %v2500_v37  ;;  %v5483_v62 = vpop.xlane.xlu1 %2408 }
 0x2b5   : > { %v5479_v25 = vpop.eup %4217  ;;  %v2178_v3 = vmul.f32 1.442695, %v2123_v13  ;;  %v2253_v26 = vsel %vm729_vm1, %v5475_v36, 0.0 }
 0x2b6   : > { %2561 = vadd.xlane.f32.xlu1 %v2560_v2  ;;  %2254 = vadd.xlane.f32.xlu0 %v2253_v26  ;;  %v2069_v11 = vpop.xlane.xlu0 %2068  ;;  %v2569_v55 = vsel %vm729_vm1, %v5479_v25, 0.0  ;;  %v2510_v2 = vmul.f32 1.442695, %v2465_v44 }
 0x2b7   : > { %4231 = vpow2.f32 %v2178_v3  ;;  %v2121_v1 = vsub.f32 %v5108_v49, %v2069_v11 }
 0x2b8   : > { %v5488_v31 = vpop.eup %4219  ;;  %4233 = vpow2.f32 %v2506_v47  ;;  %v5496_v61 = vpop.xlane.xlu1 %2405  ;;  %v2464_v47 = vsub.f32 %v5203_v18, %v5440_v32 }
 0x2b9   : > { %v5492_v37 = vpop.eup %4221  ;;  %v2174_v5 = vmul.f32 1.442695, %v2121_v1  ;;  %v2247_v9 = vsel %vm729_vm1, %v5488_v31, 0.0  ;;  %v2467_v1 = vsub.f32 %v5210_v24, %v5453_v7 }
 0x2ba   : > { %2570 = vadd.xlane.f32.xlu1 %v2569_v55  ;;  %2248 = vadd.xlane.f32.xlu0 %v2247_v9  ;;  %v2084_v49 = vpop.xlane.xlu0 %2083  ;;  %v2566_v57 = vsel %vm729_vm1, %v5492_v37, 0.0  ;;  %v2508_v32 = vmul.f32 1.442695, %v2464_v47  ;;  %v2466_v47 = vsub.f32 %v5217_v39, %v5468_v14 }
 0x2bb   : > { %4235 = vpow2.f32 %v2174_v5  ;;  %v2126_v19 = vsub.f32 %v5117_v20, %v2084_v49 }
 0x2bc   : > { %v5501_v13 = vpop.eup %4223  ;;  %4237 = vpow2.f32 %v2504_v22  ;;  %v5509_v4 = vpop.xlane.xlu1 %2414  ;;  %v2512_v14 = vmul.f32 1.442695, %v2466_v47 }
 0x2bd   : > { %6095 = vst [vmem:[#allocation51_spill] sm:$0xff] %v5501_v13  ;;  %v5507_v33 = vpop.eup %4225  ;;  %v2184_v3 = vmul.f32 1.442695, %v2126_v19  ;;  %v2262_v26 = vsel %vm729_vm1, %v5501_v13, 0.0  ;;  %v2514_v19 = vmul.f32 1.442695, %v2467_v1 }
 0x2be   : > { %2567 = vadd.xlane.f32.xlu1 %v2566_v57  ;;  %2263 = vadd.xlane.f32.xlu0 %v2262_v26  ;;  %v2078_v20 = vpop.xlane.xlu0 %2077  ;;  %v2575_v55 = vsel %vm729_vm1, %v5507_v33, 0.0 }
 0x2bf   : > { %4239 = vpow2.f32 %v2184_v3  ;;  %v2124_v11 = vsub.f32 %v5126_v51, %v2078_v20  ;;  %v2740_v51 = vld [vmem:[%s5972_s10] sm:$0x1f] }
 0x2c0   : > { %v5514_v18 = vpop.eup %4227  ;;  %4241 = vpow2.f32 %v2510_v2  ;;  %v5520_v22 = vpop.xlane.xlu1 %2411  ;;  %4024 = vmatprep.subr.msk.mxu1 %vm2837_vm2, %v2740_v51 }
 0x2c1   : > { %6096 = vst [vmem:[#allocation52_spill] sm:$0xff] %v5514_v18  ;;  %v2180_v44 = vmul.f32 1.442695, %v2124_v11  ;;  %v2256_v5 = vsel %vm729_vm1, %v5514_v18, 0.0  ;;  %v5527_v9 = vpop.eup %4229  ;;  %4025 = vmatpush3.msk.msra.mxu1 %vm2837_vm2, %v2740_v51 }
 0x2c2   : > { %2576 = vadd.xlane.f32.xlu1 %v2575_v55  ;;  %2257 = vadd.xlane.f32.xlu0 %v2256_v5  ;;  %v2087_v24 = vpop.xlane.xlu0 %2086  ;;  %v2572_v26 = vsel %vm729_vm1, %v5527_v9, 0.0 }
 0x2c3   : > { %4243 = vpow2.f32 %v2180_v44  ;;  %v2127_v7 = vsub.f32 %v5135_v35, %v2087_v24 }
 0x2c4   : > { %v5530_v49 = vpop.eup %4231  ;;  %4245 = vpow2.f32 %v2508_v32  ;;  %v5536_v2 = vpop.xlane.xlu1 %2420  ;;  %v2469_v32 = vsub.f32 %v5224_v12, %v5483_v62  ;;  %v2468_v62 = vsub.f32 %v5231_v42, %v5496_v61  ;;  %v2471_v42 = vsub.f32 %v5238_v17, %v5509_v4  ;;  %v6102_v17 = vld [vmem:[#allocation40_spill] sm:$0xff] }
 0x2c5   : > { %6097 = vst [vmem:[#allocation53_spill] sm:$0xff] %v5530_v49  ;;  %v5534_v57 = vpop.eup %4233  ;;  %v2186_v3 = vmul.f32 1.442695, %v2127_v7  ;;  %v2265_v35 = vsel %vm729_vm1, %v5530_v49, 0.0  ;;  %v2470_v4 = vsub.f32 %v6102_v17, %v5520_v22 }
 0x2c6   : > { %2573 = vadd.xlane.f32.xlu1 %v2572_v26  ;;  %2266 = vadd.xlane.f32.xlu0 %v2265_v35  ;;  %v2081_v20 = vpop.xlane.xlu0 %2080  ;;  %v2581_v44 = vsel %vm729_vm1, %v5534_v57, 0.0  ;;  %v2518_v12 = vmul.f32 1.442695, %v2469_v32  ;;  %v2516_v61 = vmul.f32 1.442695, %v2468_v62 }
 0x2c7   : > { %4247 = vpow2.f32 %v2186_v3  ;;  %v2125_v11 = vsub.f32 %v5145_v54, %v2081_v20  ;;  %v2520_v22 = vmul.f32 1.442695, %v2470_v4 }
 0x2c8   : > { %v5543_v39 = vpop.eup %4235  ;;  %4249 = vpow2.f32 %v2514_v19  ;;  %v5547_v1 = vpop.xlane.xlu1 %2417 }
 0x2c9   : > { %6098 = vst [vmem:[#allocation54_spill] sm:$0xff] %v5543_v39  ;;  %v2182_v55 = vmul.f32 1.442695, %v2125_v11  ;;  %v2259_v5 = vsel %vm729_vm1, %v5543_v39, 0.0  ;;  %v5553_v51 = vpop.eup %4237 }
 0x2ca   : > { %2582 = vadd.xlane.f32.xlu1 %v2581_v44  ;;  %2260 = vadd.xlane.f32.xlu0 %v2259_v5  ;;  %v2096_v54 = vpop.xlane.xlu0 %2095  ;;  %v2578_v3 = vsel %vm729_vm1, %v5553_v51, 0.0 }
 0x2cb   : > { %4251 = vpow2.f32 %v2182_v55  ;;  %v2130_v24 = vsub.f32 %v5154_v6, %v2096_v54 }
 0x2cc   : > { %v5556_v7 = vpop.eup %4239  ;;  %4253 = vpow2.f32 %v2512_v14  ;;  %v5560_v19 = vpop.xlane.xlu1 %2426 }
 0x2cd   : > { %6099 = vst [vmem:[#allocation55_spill] sm:$0xff] %v5556_v7  ;;  %v2192_v47 = vmul.f32 1.442695, %v2130_v24  ;;  %v2274_v26 = vsel %vm729_vm1, %v5556_v7, 0.0  ;;  %v5566_v35 = vpop.eup %4241  ;;  %v2522_v24 = vmul.f32 1.442695, %v2471_v42 }
 0x2ce   : > { %2579 = vadd.xlane.f32.xlu1 %v2578_v3  ;;  %2275 = vadd.xlane.f32.xlu0 %v2274_v26  ;;  %v2090_v6 = vpop.xlane.xlu0 %2089  ;;  %v2587_v55 = vsel %vm729_vm1, %v5566_v35, 0.0 }
 0x2cf   : > { %4255 = vpow2.f32 %v2192_v47  ;;  %v2128_v20 = vsub.f32 %v5162_v38, %v2090_v6  ;;  %v6103_v47 = vld [vmem:[#allocation38_spill] sm:$0xff] }
 0x2d0   : > { %v5569_v11 = vpop.eup %4243  ;;  %4257 = vpow2.f32 %v2518_v12  ;;  %v5573_v14 = vpop.xlane.xlu1 %2423 }
 0x2d1   : > { %6100 = vst [vmem:[#allocation56_spill] sm:$0xff] %v5569_v11  ;;  %v2188_v32 = vmul.f32 1.442695, %v2128_v20  ;;  %v2268_v44 = vsel %vm729_vm1, %v5569_v11, 0.0  ;;  %v5579_v5 = vpop.eup %4245 }
 0x2d2   : > { %2588 = vadd.xlane.f32.xlu1 %v2587_v55  ;;  %2269 = vadd.xlane.f32.xlu0 %v2268_v44  ;;  %v2099_v38 = vpop.xlane.xlu0 %2098  ;;  %v2584_v26 = vsel %vm729_vm1, %v5579_v5, 0.0 }
 0x2d3   : > { %4259 = vpow2.f32 %v2188_v32  ;;  %v2131_v3 = vsub.f32 %v6103_v47, %v2099_v38  ;;  %v6104_v32 = vld [vmem:[#allocation39_spill] sm:$0xff]  ;;  %v6106_v38 = vld [vmem:[#allocation41_spill] sm:$0xff] }
 0x2d4   : > { %v5581_v54 = vpop.eup %4247  ;;  %4261 = vpow2.f32 %v2516_v61  ;;  %v2433_v62 = vpop.xlane.xlu1 %2432  ;;  %v2473_v17 = vsub.f32 %v6106_v38, %v5536_v2  ;;  %v6108_v2 = vld [vmem:[#allocation42_spill] sm:$0xff] }
 0x2d5   : > { %6101 = vst [vmem:[#allocation57_spill] sm:$0xff] %v5581_v54  ;;  %v5585_v12 = vpop.eup %4249  ;;  %v2277_v6 = vsel %vm729_vm1, %v5581_v54, 0.0  ;;  %4263 = vpow2.f32 %v2522_v24  ;;  %v2194_v47 = vmul.f32 1.442695, %v2131_v3  ;;  %v2472_v3 = vsub.f32 %v6108_v2, %v5547_v1 }
 0x2d6   : > { %2585 = vadd.xlane.f32.xlu1 %v2584_v26  ;;  %2278 = vadd.xlane.f32.xlu0 %v2277_v6  ;;  %v2093_v20 = vpop.xlane.xlu0 %2092  ;;  %v2593_v61 = vsel %vm729_vm1, %v5585_v12, 0.0 }
 0x2d7   : > { %v2129_v42 = vsub.f32 %v6104_v32, %v2093_v20  ;;  %v2526_v32 = vmul.f32 1.442695, %v2473_v17  ;;  %v2524_v38 = vmul.f32 1.442695, %v2472_v3 }
 0x2d8   : > { %v5593_v55 = vpop.eup %4251  ;;  %v2430_v6 = vpop.xlane.xlu1 %2429 }
 0x2d9   : > { %6105 = vst [vmem:[#allocation40_spill] sm:$0xff] %v5593_v55  ;;  %v5597_v44 = vpop.eup %4253  ;;  %v2190_v7 = vmul.f32 1.442695, %v2129_v42  ;;  %v2271_v26 = vsel %vm729_vm1, %v5593_v55, 0.0  ;;  %v6115_v55 = vld [vmem:[#allocation46_spill] sm:$0xff] }
 0x2da   : > { %2594 = vadd.xlane.f32.xlu1 %v2593_v61  ;;  %2272 = vadd.xlane.f32.xlu0 %v2271_v26  ;;  %v2590_v24 = vsel %vm729_vm1, %v5597_v44, 0.0  ;;  %v6110_v26 = vld [vmem:[#allocation43_spill] sm:$0xff]  ;;  %v2476_v11 = vsub.f32 %v6115_v55, %v2430_v6  ;;  %v6119_v6 = vld [vmem:[#allocation48_spill] sm:$0xff] }
 0x2db   : > { %4265 = vpow2.f32 %v2190_v7  ;;  %v2475_v17 = vsub.f32 %v6110_v26, %v5560_v19 }
 0x2dc   : > { %v5603_v20 = vpop.eup %4255  ;;  %4267 = vpow2.f32 %v2520_v22  ;;  %v2439_v7 = vpop.xlane.xlu1 %2438 }
 0x2dd   : > { %6107 = vst [vmem:[#allocation38_spill] sm:$0xff] %v5603_v20  ;;  %v5607_v4 = vpop.eup %4257  ;;  %4269 = vpow2.f32 %v2194_v47  ;;  %v2286_v42 = vsel %vm729_vm1, %v5603_v20, 0.0  ;;  %v2530_v2 = vmul.f32 1.442695, %v2475_v17 }
 0x2de   : > { %2591 = vadd.xlane.f32.xlu1 %v2590_v24  ;;  %2287 = vadd.xlane.f32.xlu0 %v2286_v42  ;;  %v2599_v22 = vsel %vm729_vm1, %v5607_v4, 0.0  ;;  %4271 = vpow2.f32 %v2526_v32  ;;  %v6111_v42 = vld [vmem:[#allocation44_spill] sm:$0xff] }
 0x2df   : > { %4273 = vpow2.f32 %v2524_v38  ;;  %v2474_v20 = vsub.f32 %v6111_v42, %v5573_v14 }
 0x2e0   : > { %v5613_v61 = vpop.eup %4259  ;;  %v2436_v3 = vpop.xlane.xlu1 %2435  ;;  %4275 = vpow2.f32 %v2530_v2 }
 0x2e1   : > { %6109 = vst [vmem:[#allocation39_spill] sm:$0xff] %v5613_v61  ;;  %v2280_v1 = vsel %vm729_vm1, %v5613_v61, 0.0  ;;  %v5621_v47 = vpop.eup %4261 }
 0x2e2   : > { %2600 = vadd.xlane.f32.xlu1 %v2599_v22  ;;  %2281 = vadd.xlane.f32.xlu0 %v2280_v1  ;;  %v5623_v24 = vpop.eup %4263  ;;  %v2596_v32 = vsel %vm729_vm1, %v5621_v47, 0.0  ;;  %v2528_v22 = vmul.f32 1.442695, %v2474_v20  ;;  %v6113_v1 = vld [vmem:[#allocation45_spill] sm:$0xff] }
 0x2e3   : > { %v2605_v26 = vsel %vm729_vm1, %v5623_v24, 0.0  ;;  %v2477_v38 = vsub.f32 %v6113_v1, %v2433_v62  ;;  %v2532_v62 = vmul.f32 1.442695, %v2476_v11  ;;  %v6117_v1 = vld [vmem:[#allocation47_spill] sm:$0xff] }
 0x2e4   : > { %v2445_v42 = vpop.xlane.xlu1 %2444  ;;  %4277 = vpow2.f32 %v2528_v22 }
 0x2e5   : > { %v2534_v54 = vmul.f32 1.442695, %v2477_v38  ;;  %v2478_v38 = vsub.f32 %v6119_v6, %v2436_v3 }
 0x2e6   : > { %2597 = vadd.xlane.f32.xlu1 %v2596_v32 }
 0x2e7   : > { %4279 = vpow2.f32 %v2534_v54 }
 0x2e8   : > { %v5629_v19 = vpop.eup %4265  ;;  %v2442_v22 = vpop.xlane.xlu1 %2441  ;;  %4281 = vpow2.f32 %v2532_v62 }
 0x2e9   : > { %6112 = vst [vmem:[#allocation41_spill] sm:$0xff] %v5629_v19  ;;  %v5633_v61 = vpop.eup %4267  ;;  %v2283_v17 = vsel %vm729_vm1, %v5629_v19, 0.0  ;;  %v2480_v6 = vsub.f32 %v5309_v48, %v2442_v22 }
 0x2ea   : > { %v5638_v14 = vpop.eup %4269  ;;  %2606 = vadd.xlane.f32.xlu1 %v2605_v26  ;;  %2284 = vadd.xlane.f32.xlu0 %v2283_v17  ;;  %v2602_v32 = vsel %vm729_vm1, %v5633_v61, 0.0  ;;  %v2479_v26 = vsub.f32 %v6117_v1, %v2439_v7  ;;  %v2536_v7 = vmul.f32 1.442695, %v2478_v38 }
 0x2eb   : > { %6114 = vst [vmem:[#allocation42_spill] sm:$0xff] %v5638_v14  ;;  %v2289_v20 = vsel %vm729_vm1, %v5638_v14, 0.0  ;;  %v5645_v2 = vpop.eup %4271 }
 0x2ec   : > { %6116 = vst [vmem:[#allocation43_spill] sm:$0xff] %v5645_v2  ;;  %v2611_v17 = vsel %vm729_vm1, %v5645_v2, 0.0  ;;  %v5650_v19 = vpop.eup %4273  ;;  %v2538_v55 = vmul.f32 1.442695, %v2479_v26  ;;  %v2451_v54 = vpop.xlane.xlu1 %2450 }
 0x2ed   : > { %6118 = vst [vmem:[#allocation44_spill] sm:$0xff] %v5650_v19  ;;  %v2608_v14 = vsel %vm729_vm1, %v5650_v19, 0.0  ;;  %v2483_v48 = vsub.f32 %v5315_v41, %v2451_v54 }
 0x2ee   : > { %2603 = vadd.xlane.f32.xlu1 %v2602_v32  ;;  %2290 = vadd.xlane.f32.xlu0 %v2289_v20  ;;  %v5655_v32 = vpop.eup %4275  ;;  %4283 = vpow2.f32 %v2538_v55  ;;  %v6121_v20 = vld [vmem:[#allocation49_spill] sm:$0xff] }
 0x2ef   : > { %6120 = vst [vmem:[#allocation45_spill] sm:$0xff] %v5655_v32  ;;  %v2481_v1 = vsub.f32 %v6121_v20, %v2445_v42  ;;  %4285 = vpow2.f32 %v2536_v7  ;;  %v2540_v42 = vmul.f32 1.442695, %v2480_v6 }
 0x2f0   : > { %v2448_v55 = vpop.xlane.xlu1 %2447 }
 0x2f1   : > { %v5662_v62 = vpop.eup %4277  ;;  %v2542_v26 = vmul.f32 1.442695, %v2481_v1  ;;  %v2482_v20 = vsub.f32 %v5322_v43, %v2448_v55  ;;  %v2546_v43 = vmul.f32 1.442695, %v2483_v48 }
 0x2f2   : > { %2612 = vadd.xlane.f32.xlu1 %v2611_v17  ;;  %v2617_v17 = vsel %vm729_vm1, %v5655_v32, 0.0  ;;  %6122 = vst [vmem:[#allocation46_spill] sm:$0xff] %v5662_v62 }
 0x2f3   : > { %4287 = vpow2.f32 %v2542_v26  ;;  %v2544_v22 = vmul.f32 1.442695, %v2482_v20 }
 0x2f4   : > { %v5667_v49 = vpop.eup %4279  ;;  %4289 = vpow2.f32 %v2540_v42 }
 0x2f5   : > { %6123 = vst [vmem:[#allocation47_spill] sm:$0xff] %v5667_v49  ;;  %v5672_v13 = vpop.eup %4281  ;;  %4291 = vpow2.f32 %v2544_v22 }
 0x2f6   : > { %2609 = vadd.xlane.f32.xlu1 %v2608_v14  ;;  %v2614_v14 = vsel %vm729_vm1, %v5662_v62, 0.0  ;;  %6124 = vst [vmem:[#allocation48_spill] sm:$0xff] %v5672_v13  ;;  %v2620_v1 = vsel %vm729_vm1, %v5672_v13, 0.0  ;;  %4293 = vpow2.f32 %v2546_v43 }
 0x2f7   : > { %v5657_v11 = vpop.xlane.xlu0 %2203 }
 0x2fa   : > { %2618 = vadd.xlane.f32.xlu1 %v2617_v17  ;;  %v2623_v17 = vsel %vm729_vm1, %v5667_v49, 0.0 }
 0x2fb   : > { %v2198_v3 = vpop.xlane.xlu0 %2197 }
 0x2fe   : > { %2615 = vadd.xlane.f32.xlu1 %v2614_v14  ;;  %v5677_v14 = vpop.eup %4283 }
 0x2ff   : > { %v2207_v38 = vpop.xlane.xlu0 %2206  ;;  %6125 = vst [vmem:[#allocation49_spill] sm:$0xff] %v5677_v14  ;;  %v2629_v6 = vsel %vm729_vm1, %v5677_v14, 0.0  ;;  %v5683_v55 = vpop.eup %4285 }
 0x300   : > { %6126 = vst [vmem:[#allocation58_spill] sm:$0xff] %v5683_v55  ;;  %v2626_v41 = vsel %vm729_vm1, %v5683_v55, 0.0  ;;  %v5687_v54 = vpop.eup %4287 }
 0x301   : > { %6127 = vst [vmem:[#allocation59_spill] sm:$0xff] %v5687_v54  ;;  %v5691_v48 = vpop.eup %4289 }
 0x302   : > { %2624 = vadd.xlane.f32.xlu1 %v2623_v17  ;;  %v2635_v17 = vsel %vm729_vm1, %v5687_v54, 0.0  ;;  %6128 = vst [vmem:[#allocation60_spill] sm:$0xff] %v5691_v48 }
 0x303   : > { %v2201_v7 = vpop.xlane.xlu0 %2200 }
 0x306   : > { %2621 = vadd.xlane.f32.xlu1 %v2620_v1  ;;  %v2632_v1 = vsel %vm729_vm1, %v5691_v48, 0.0 }
 0x307   : > { %v5679_v26 = vpop.xlane.xlu0 %2215 }
 0x30a   : > { %2630 = vadd.xlane.f32.xlu1 %v2629_v6  ;;  %v5695_v6 = vpop.eup %4291 }
 0x30b   : > { %v2210_v42 = vpop.xlane.xlu0 %2209  ;;  %6129 = vst [vmem:[#allocation61_spill] sm:$0xff] %v5695_v6  ;;  %v2638_v43 = vsel %vm729_vm1, %v5695_v6, 0.0  ;;  %v5699_v55 = vpop.eup %4293 }
 0x30c   : > { %6130 = vst [vmem:[#allocation62_spill] sm:$0xff] %v5699_v55  ;;  %v2641_v54 = vsel %vm729_vm1, %v5699_v55, 0.0 }
 0x30e   : > { %2627 = vadd.xlane.f32.xlu1 %v2626_v41 }
 0x30f   : > { %v2219_v20 = vpop.xlane.xlu0 %2218 }
 0x312   : > { %2636 = vadd.xlane.f32.xlu1 %v2635_v17 }
 0x313   : > { %v2213_v22 = vpop.xlane.xlu0 %2212 }
 0x315   : > { %v2553_v48 = vpop.xlane.xlu1 %2552 }
 0x316   : > { %2633 = vadd.xlane.f32.xlu1 %v2632_v1  ;;  %4295 = vrcp.f32 %v2553_v48 }
 0x317   : > { %v5701_v41 = vpop.xlane.xlu0 %2227  ;;  %4297 = vrcp.f32 %v2198_v3 }
 0x318   : > { %4299 = vrcp.f32 %v2201_v7 }
 0x31a   : > { %2639 = vadd.xlane.f32.xlu1 %v2638_v43 }
 0x31b   : > { %v5705_v17 = vpop.xlane.xlu0 %2221 }
 0x31e   : > { %2642 = vadd.xlane.f32.xlu1 %v2641_v54 }
 0x31f   : > { %v5707_v14 = vpop.xlane.xlu0 %2230 }
 0x323   : > { %v5709_v13 = vpop.xlane.xlu0 %2224  ;;  %v4296_v55 = vpop.eup %4295 }
 0x324   : > { %v4298_v62 = vpop.eup %4297  ;;  %v2677_v3 = vmul.f32 %v4296_v55, %v5373_v60 }
 0x325   : > { %v4300_v39 = vpop.eup %4299 }
 0x327   : > { %v5711_v6 = vpop.xlane.xlu0 %2239 }
 0x32b   : > { %v5714_v43 = vpop.xlane.xlu0 %2233 }
 0x32f   : > { %v2550_v1 = vpop.xlane.xlu1 %2549  ;;  %v5717_v7 = vpop.xlane.xlu0 %2242 }
 0x330   : > { %4301 = vrcp.f32 %v2550_v1 }
 0x333   : > { %v2559_v49 = vpop.xlane.xlu1 %2558  ;;  %v5724_v55 = vpop.xlane.xlu0 %2236 }
 0x334   : > { %4303 = vrcp.f32 %v2559_v49  ;;  %v2324_v49 = vmul.f32 %v4298_v62, %v5336_v15 }
 0x335   : > { %4305 = vrcp.f32 %v5657_v11 }
 0x336   : > { %4307 = vrcp.f32 %v2207_v38  ;;  %v2325_v38 = vmul.f32 %v4300_v39, %v5345_v21 }
 0x337   : > { %v2556_v54 = vpop.xlane.xlu1 %2555 }
 0x338   : > { %4309 = vrcp.f32 %v2556_v54  ;;  %v2709_v19 = vmul.f32 %v2677_v3, %v2325_v38  ;;  %v5731_v3 = vpop.xlane.xlu0 %2251 }
 0x33b   : > { %v2565_v32 = vpop.xlane.xlu1 %2564 }
 0x33c   : > { %4311 = vrcp.f32 %v2565_v32 }
 0x33d   : > { %v4302_v48 = vpop.eup %4301  ;;  %4313 = vrcp.f32 %v2210_v42 }
 0x33e   : > { %v2676_v11 = vmul.f32 %v4302_v48, %v5423_v50  ;;  %4315 = vrcp.f32 %v2213_v22 }
 0x33f   : > { %v2562_v1 = vpop.xlane.xlu1 %2561 }
 0x340   : > { %4317 = vrcp.f32 %v2562_v1  ;;  %v2708_v54 = vmul.f32 %v2676_v11, %v2324_v49  ;;  %v5741_v11 = vpop.xlane.xlu0 %2245 }
 0x341   : > { %v4304_v18 = vpop.eup %4303 }
 0x342   : > { %4026 = vmatprep.mubr.msk.f32.mxu1 %vm729_vm1, %v2708_v54  ;;  %v4306_v2 = vpop.eup %4305  ;;  %v2679_v50 = vmul.f32 %v4304_v18, %v5427_v59 }
 0x343   : > { %v2571_v60 = vpop.xlane.xlu1 %2570  ;;  %4027 = vmatmul.mubr.msk.f32.vlgmr.msra.gmra.mxu1 %vm729_vm1, %v2709_v19  ;;  %v4308_v32 = vpop.eup %4307  ;;  %v2326_v21 = vmul.f32 %v4306_v2, %v5331_v34 }
 0x344   : > { %4319 = vrcp.f32 %v2571_v60  ;;  %v2327_v42 = vmul.f32 %v4308_v32, %v5341_v29 }
 0x345   : > { %v4310_v15 = vpop.eup %4309  ;;  %4321 = vrcp.f32 %v5679_v26 }
 0x346   : > { %v2678_v39 = vmul.f32 %v4310_v15, %v5446_v45  ;;  %4323 = vrcp.f32 %v2219_v20  ;;  %v2711_v19 = vmul.f32 %v2679_v50, %v2327_v42 }
 0x347   : > { %v2568_v62 = vpop.xlane.xlu1 %2567 }
 0x348   : > { %4325 = vrcp.f32 %v2568_v62  ;;  %v2710_v22 = vmul.f32 %v2678_v39, %v2326_v21 }
 0x349   : > { %v4312_v48 = vpop.eup %4311 }
 0x34a   : > { %4029 = vmatprep.mubr.msk.f32.mxu1 %vm729_vm1, %v2710_v22  ;;  %v4314_v49 = vpop.eup %4313  ;;  %v2681_v45 = vmul.f32 %v4312_v48, %v5459_v23 }
 0x34b   : > { %v2577_v59 = vpop.xlane.xlu1 %2576  ;;  %4030 = vmatmul.mubr.msk.f32.gmra.mxu1 %vm729_vm1, %v2711_v19  ;;  %v4316_v18 = vpop.eup %4315  ;;  %v2328_v29 = vmul.f32 %v4314_v49, %v5356_v28 }
 0x34c   : > { %4327 = vrcp.f32 %v2577_v59  ;;  %v2329_v20 = vmul.f32 %v4316_v18, %v5366_v46  ;;  %v5747_v46 = vpop.xlane.xlu0 %2254 }
 0x34d   : > { %v4318_v34 = vpop.eup %4317  ;;  %4329 = vrcp.f32 %v5705_v17 }
 0x34e   : > { %v2680_v2 = vmul.f32 %v4318_v34, %v5466_v52  ;;  %4331 = vrcp.f32 %v5709_v13  ;;  %v2713_v1 = vmul.f32 %v2681_v45, %v2329_v20 }
 0x34f   : > { %v2574_v26 = vpop.xlane.xlu1 %2573 }
 0x350   : > { %4333 = vrcp.f32 %v2574_v26  ;;  %v2712_v38 = vmul.f32 %v2680_v2, %v2328_v29  ;;  %v2249_v22 = vpop.xlane.xlu0 %2248 }
 0x351   : > { %v4320_v54 = vpop.eup %4319 }
 0x352   : > { %4032 = vmatprep.mubr.msk.f32.mxu1 %vm729_vm1, %v2712_v38  ;;  %v4322_v23 = vpop.eup %4321  ;;  %v2683_v52 = vmul.f32 %v4320_v54, %v5479_v25 }
 0x353   : > { %v2583_v60 = vpop.xlane.xlu1 %2582  ;;  %4033 = vmatmul.mubr.msk.f32.gmra.mxu1 %vm729_vm1, %v2713_v1  ;;  %v4324_v28 = vpop.eup %4323  ;;  %v2330_v13 = vmul.f32 %v4322_v23, %v5350_v30 }
 0x354   : > { %4335 = vrcp.f32 %v2583_v60  ;;  %v2331_v50 = vmul.f32 %v4324_v28, %v5361_v8  ;;  %v5761_v34 = vpop.xlane.xlu0 %2263 }
 0x355   : > { %v4326_v17 = vpop.eup %4325  ;;  %4337 = vrcp.f32 %v5701_v41 }
 0x356   : > { %v2682_v32 = vmul.f32 %v4326_v17, %v5492_v37  ;;  %4339 = vrcp.f32 %v5707_v14  ;;  %v2715_v39 = vmul.f32 %v2683_v52, %v2331_v50 }
 0x357   : > { %v2580_v15 = vpop.xlane.xlu1 %2579 }
 0x358   : > { %4341 = vrcp.f32 %v2580_v15  ;;  %v2714_v21 = vmul.f32 %v2682_v32, %v2330_v13  ;;  %v2258_v20 = vpop.xlane.xlu0 %2257 }
 0x359   : > { %v4328_v62 = vpop.eup %4327 }
 0x35a   : > { %4035 = vmatprep.mubr.msk.f32.mxu1 %vm729_vm1, %v2714_v21  ;;  %v4330_v25 = vpop.eup %4329  ;;  %v2685_v37 = vmul.f32 %v4328_v62, %v5507_v33 }
 0x35b   : > { %v2589_v42 = vpop.xlane.xlu1 %2588  ;;  %4036 = vmatmul.mubr.msk.f32.gmra.mxu1 %vm729_vm1, %v2715_v39  ;;  %v4332_v41 = vpop.eup %4331  ;;  %v2332_v8 = vmul.f32 %v4330_v25, %v5380_v63 }
 0x35c   : > { %4343 = vrcp.f32 %v2589_v42  ;;  %v2333_v48 = vmul.f32 %v4332_v41, %v5396_v0  ;;  %v6131_v0 = vld [vmem:[#allocation50_spill] sm:$0xff] }
 0x35d   : > { %v4334_v30 = vpop.eup %4333  ;;  %4345 = vrcp.f32 %v5714_v43 }
 0x35e   : > { %v2684_v14 = vmul.f32 %v4334_v30, %v5527_v9  ;;  %4347 = vrcp.f32 %v5724_v55  ;;  %v2717_v59 = vmul.f32 %v2685_v37, %v2333_v48 }
 0x35f   : > { %v2586_v19 = vpop.xlane.xlu1 %2585 }
 0x360   : > { %4349 = vrcp.f32 %v2586_v19  ;;  %v2716_v49 = vmul.f32 %v2684_v14, %v2332_v8 }
 0x361   : > { %v4336_v18 = vpop.eup %4335 }
 0x362   : > { %4038 = vmatprep.mubr.msk.f32.mxu1 %vm729_vm1, %v2716_v49  ;;  %v4338_v33 = vpop.eup %4337  ;;  %v2687_v9 = vmul.f32 %v4336_v18, %v5534_v57 }
 0x363   : > { %v2595_v45 = vpop.xlane.xlu1 %2594  ;;  %4039 = vmatmul.mubr.msk.f32.gmra.mxu1 %vm729_vm1, %v2717_v59  ;;  %v4340_v63 = vpop.eup %4339  ;;  %v2334_v55 = vmul.f32 %v4338_v33, %v6131_v0 }
 0x364   : > { %4351 = vrcp.f32 %v2595_v45  ;;  %v2335_v26 = vmul.f32 %v4340_v63, %v5388_v27 }
 0x365   : > { %v4342_v43 = vpop.eup %4341  ;;  %4353 = vrcp.f32 %v5711_v6 }
 0x366   : > { %v2686_v29 = vmul.f32 %v4342_v43, %v5553_v51  ;;  %4355 = vrcp.f32 %v5717_v7  ;;  %v2719_v1 = vmul.f32 %v2687_v9, %v2335_v26  ;;  %v2267_v7 = vpop.xlane.xlu0 %2266 }
 0x367   : > { %v2592_v2 = vpop.xlane.xlu1 %2591 }
 0x368   : > { %4357 = vrcp.f32 %v2592_v2  ;;  %v2718_v38 = vmul.f32 %v2686_v29, %v2334_v55 }
 0x369   : > { %v4344_v54 = vpop.eup %4343 }
 0x36a   : > { %4041 = vmatprep.mubr.msk.f32.mxu1 %vm729_vm1, %v2718_v38  ;;  %v4346_v23 = vpop.eup %4345  ;;  %v2689_v51 = vmul.f32 %v4344_v54, %v5566_v35  ;;  %v6133_v38 = vld [vmem:[#allocation52_spill] sm:$0xff] }
 0x36b   : > { %v2601_v57 = vpop.xlane.xlu1 %2600  ;;  %4042 = vmatmul.mubr.msk.f32.gmra.mxu1 %vm729_vm1, %v2719_v1  ;;  %v4348_v6 = vpop.eup %4347  ;;  %v2336_v27 = vmul.f32 %v4346_v23, %v5412_v10 }
 0x36c   : > { %4359 = vrcp.f32 %v2601_v57  ;;  %v2337_v52 = vmul.f32 %v4348_v6, %v5436_v58  ;;  %v6135_v57 = vld [vmem:[#allocation54_spill] sm:$0xff] }
 0x36d   : > { %v4350_v60 = vpop.eup %4349  ;;  %4361 = vrcp.f32 %v5741_v11  ;;  %v2261_v11 = vpop.xlane.xlu0 %2260 }
 0x36e   : > { %v2688_v28 = vmul.f32 %v4350_v60, %v5579_v5  ;;  %4363 = vrcp.f32 %v2249_v22  ;;  %v2721_v32 = vmul.f32 %v2689_v51, %v2337_v52 }
 0x36f   : > { %v2598_v17 = vpop.xlane.xlu1 %2597 }
 0x370   : > { %4365 = vrcp.f32 %v2598_v17  ;;  %v2720_v13 = vmul.f32 %v2688_v28, %v2336_v27 }
 0x371   : > { %v4352_v15 = vpop.eup %4351  ;;  %v5786_v30 = vpop.xlane.xlu0 %2275 }
 0x372   : > { %4044 = vmatprep.mubr.msk.f32.mxu1 %vm729_vm1, %v2720_v13  ;;  %v4354_v50 = vpop.eup %4353  ;;  %v2691_v10 = vmul.f32 %v4352_v15, %v5585_v12 }
 0x373   : > { %v2607_v21 = vpop.xlane.xlu1 %2606  ;;  %4045 = vmatmul.mubr.msk.f32.gmra.mxu1 %vm729_vm1, %v2721_v32  ;;  %v4356_v35 = vpop.eup %4355  ;;  %v2338_v58 = vmul.f32 %v4354_v50, %v5404_v16  ;;  %v6136_v32 = vld [vmem:[#allocation45_spill] sm:$0xff]  ;;  %v6137_v50 = vld [vmem:[#allocation51_spill] sm:$0xff] }
 0x374   : > { %4367 = vrcp.f32 %v2607_v21  ;;  %v2339_v25 = vmul.f32 %v4356_v35, %v5420_v40  ;;  %v6138_v35 = vld [vmem:[#allocation46_spill] sm:$0xff] }
 0x375   : > { %v4358_v39 = vpop.eup %4357  ;;  %4369 = vrcp.f32 %v5731_v3  ;;  %v2270_v19 = vpop.xlane.xlu0 %2269 }
 0x376   : > { %v2690_v5 = vmul.f32 %v4358_v39, %v5597_v44  ;;  %4371 = vrcp.f32 %v5747_v46  ;;  %v2723_v41 = vmul.f32 %v2691_v10, %v2339_v25  ;;  %v6139_v10 = vld [vmem:[#allocation53_spill] sm:$0xff] }
 0x377   : > { %v2604_v62 = vpop.xlane.xlu1 %2603 }
 0x378   : > { %4373 = vrcp.f32 %v2604_v62  ;;  %v2722_v42 = vmul.f32 %v2690_v5, %v2338_v58 }
 0x379   : > { %v4360_v22 = vpop.eup %4359 }
 0x37a   : > { %4047 = vmatprep.mubr.msk.f32.mxu1 %vm729_vm1, %v2722_v42  ;;  %v4362_v12 = vpop.eup %4361  ;;  %v2693_v44 = vmul.f32 %v4360_v22, %v5607_v4 }
 0x37b   : > { %v2613_v37 = vpop.xlane.xlu1 %2612  ;;  %4048 = vmatmul.mubr.msk.f32.gmra.mxu1 %vm729_vm1, %v2723_v41  ;;  %v4364_v16 = vpop.eup %4363  ;;  %v2340_v40 = vmul.f32 %v4362_v12, %v5462_v56 }
 0x37c   : > { %4375 = vrcp.f32 %v2613_v37  ;;  %v2341_v14 = vmul.f32 %v4364_v16, %v5488_v31  ;;  %v6140_v16 = vld [vmem:[#allocation47_spill] sm:$0xff] }
 0x37d   : > { %v4366_v3 = vpop.eup %4365  ;;  %4377 = vrcp.f32 %v2258_v20 }
 0x37e   : > { %v2692_v46 = vmul.f32 %v4366_v3, %v5621_v47  ;;  %4379 = vrcp.f32 %v2261_v11  ;;  %v2725_v49 = vmul.f32 %v2693_v44, %v2341_v14  ;;  %v2279_v47 = vpop.xlane.xlu0 %2278  ;;  %v6141_v44 = vld [vmem:[#allocation56_spill] sm:$0xff] }
 0x37f   : > { %v2610_v8 = vpop.xlane.xlu1 %2609 }
 0x380   : > { %4381 = vrcp.f32 %v2610_v8  ;;  %v2724_v48 = vmul.f32 %v2692_v46, %v2340_v40  ;;  %v6142_v46 = vld [vmem:[#allocation48_spill] sm:$0xff] }
 0x381   : > { %v4368_v59 = vpop.eup %4367 }
 0x382   : > { %4050 = vmatprep.mubr.msk.f32.mxu1 %vm729_vm1, %v2724_v48  ;;  %v4370_v18 = vpop.eup %4369  ;;  %v2695_v56 = vmul.f32 %v4368_v59, %v5623_v24 }
 0x383   : > { %v2619_v33 = vpop.xlane.xlu1 %2618  ;;  %4051 = vmatmul.mubr.msk.f32.gmra.mxu1 %vm729_vm1, %v2725_v49  ;;  %v4372_v4 = vpop.eup %4371  ;;  %v2342_v31 = vmul.f32 %v4370_v18, %v5449_v53  ;;  %v6132_v53 = vld [vmem:[#allocation43_spill] sm:$0xff] }
 0x384   : > { %4383 = vrcp.f32 %v2619_v33  ;;  %v2343_v9 = vmul.f32 %v4372_v4, %v5475_v36  ;;  %v6134_v36 = vld [vmem:[#allocation44_spill] sm:$0xff] }
 0x385   : > { %v4374_v45 = vpop.eup %4373  ;;  %4385 = vrcp.f32 %v5761_v34  ;;  %v2273_v34 = vpop.xlane.xlu0 %2272 }
 0x386   : > { %v2694_v63 = vmul.f32 %v4374_v45, %v5633_v61  ;;  %4387 = vrcp.f32 %v2267_v7  ;;  %v2727_v55 = vmul.f32 %v2695_v56, %v2343_v9 }
 0x387   : > { %v2616_v43 = vpop.xlane.xlu1 %2615 }
 0x388   : > { %4389 = vrcp.f32 %v2616_v43  ;;  %v2726_v0 = vmul.f32 %v2694_v63, %v2342_v31  ;;  %v6144_v31 = vld [vmem:[#allocation49_spill] sm:$0xff]  ;;  %v6145_v43 = vld [vmem:[#allocation55_spill] sm:$0xff] }
 0x389   : > { %v4376_v29 = vpop.eup %4375  ;;  %v2288_v27 = vpop.xlane.xlu0 %2287 }
 0x38a   : > { %4053 = vmatprep.mubr.msk.f32.mxu1 %vm729_vm1, %v2726_v0  ;;  %v4378_v2 = vpop.eup %4377  ;;  %v2697_v61 = vmul.f32 %v4376_v29, %v6132_v53  ;;  %v6146_v0 = vld [vmem:[#allocation58_spill] sm:$0xff] }
 0x38b   : > { %v2625_v26 = vpop.xlane.xlu1 %2624  ;;  %4054 = vmatmul.mubr.msk.f32.gmra.mxu1 %vm729_vm1, %v2727_v55  ;;  %v4380_v24 = vpop.eup %4379  ;;  %v2344_v1 = vmul.f32 %v4378_v2, %v6133_v38  ;;  %v6147_v2 = vld [vmem:[#allocation57_spill] sm:$0xff] }
 0x38c   : > { %4391 = vrcp.f32 %v2625_v26  ;;  %v2345_v6 = vmul.f32 %v4380_v24, %v6135_v57  ;;  %v6150_v57 = vld [vmem:[#allocation60_spill] sm:$0xff] }
 0x38d   : > { %v4382_v20 = vpop.eup %4381  ;;  %4393 = vrcp.f32 %v2270_v19  ;;  %v2282_v5 = vpop.xlane.xlu0 %2281  ;;  %v6143_v19 = vld [vmem:[#allocation40_spill] sm:$0xff] }
 0x38e   : > { %v2696_v54 = vmul.f32 %v4382_v20, %v6134_v36  ;;  %4395 = vrcp.f32 %v2273_v34  ;;  %v2729_v51 = vmul.f32 %v2697_v61, %v2345_v6 }
 0x38f   : > { %v2622_v23 = vpop.xlane.xlu1 %2621 }
 0x390   : > { %4397 = vrcp.f32 %v2622_v23  ;;  %v2728_v60 = vmul.f32 %v2696_v54, %v2344_v1  ;;  %v6148_v1 = vld [vmem:[#allocation59_spill] sm:$0xff] }
 0x391   : > { %v4384_v7 = vpop.eup %4383  ;;  %v2285_v12 = vpop.xlane.xlu0 %2284  ;;  %v6149_v54 = vld [vmem:[#allocation39_spill] sm:$0xff] }
 0x392   : > { %4056 = vmatprep.mubr.msk.f32.mxu1 %vm729_vm1, %v2728_v60  ;;  %v4386_v28 = vpop.eup %4385  ;;  %v2699_v15 = vmul.f32 %v4384_v7, %v6136_v32  ;;  %v6153_v32 = vld [vmem:[#allocation61_spill] sm:$0xff] }
 0x393   : > { %v2631_v17 = vpop.xlane.xlu1 %2630  ;;  %4057 = vmatmul.mubr.msk.f32.gmra.mxu1 %vm729_vm1, %v2729_v51  ;;  %v4388_v52 = vpop.eup %4387  ;;  %v2346_v21 = vmul.f32 %v4386_v28, %v6137_v50  ;;  %v6151_v51 = vld [vmem:[#allocation41_spill] sm:$0xff] }
 0x394   : > { %4399 = vrcp.f32 %v2631_v17  ;;  %v2347_v58 = vmul.f32 %v4388_v52, %v6139_v10  ;;  %v6152_v52 = vld [vmem:[#allocation38_spill] sm:$0xff] }
 0x395   : > { %v4390_v13 = vpop.eup %4389  ;;  %4401 = vrcp.f32 %v5786_v30  ;;  %v2291_v4 = vpop.xlane.xlu0 %2290  ;;  %v6155_v10 = vld [vmem:[#allocation62_spill] sm:$0xff] }
 0x396   : > { %v2698_v11 = vmul.f32 %v4390_v13, %v6138_v35  ;;  %4403 = vrcp.f32 %v2279_v47  ;;  %v2731_v25 = vmul.f32 %v2699_v15, %v2347_v58 }
 0x397   : > { %v2628_v39 = vpop.xlane.xlu1 %2627 }
 0x398   : > { %4405 = vrcp.f32 %v2628_v39  ;;  %v2730_v62 = vmul.f32 %v2698_v11, %v2346_v21  ;;  %v6154_v11 = vld [vmem:[#allocation42_spill] sm:$0xff] }
 0x399   : > { %v4392_v42 = vpop.eup %4391 }
 0x39a   : > { %4059 = vmatprep.mubr.msk.f32.mxu1 %vm729_vm1, %v2730_v62  ;;  %v4394_v41 = vpop.eup %4393  ;;  %v2701_v3 = vmul.f32 %v4392_v42, %v6140_v16  ;;  %v4166_v62 = vld [vmem:[%s5845_s26 + $0x4] ss:$8 sps:$4 sm:$0xff]  }
 0x39b   : > { %v2637_v22 = vpop.xlane.xlu1 %2636  ;;  %4060 = vmatmul.mubr.msk.f32.gmra.mxu1 %vm729_vm1, %v2731_v25  ;;  %v4396_v30 = vpop.eup %4395  ;;  %v2348_v40 = vmul.f32 %v4394_v41, %v6141_v44  ;;  %3176 = vmatprep.mubr.bf16.mxu0 %v4166_v62 }
 0x39c   : > { %4407 = vrcp.f32 %v2637_v22  ;;  %v2349_v48 = vmul.f32 %v4396_v30, %v6143_v19 }
 0x39d   : > { %v4398_v37 = vpop.eup %4397  ;;  %4409 = vrcp.f32 %v2282_v5 }
 0x39e   : > { %v2700_v8 = vmul.f32 %v4398_v37, %v6142_v46  ;;  %4411 = vrcp.f32 %v2285_v12  ;;  %v2733_v59 = vmul.f32 %v2701_v3, %v2349_v48 }
 0x39f   : > { %v2634_v14 = vpop.xlane.xlu1 %2633 }
 0x3a0   : > { %4413 = vrcp.f32 %v2634_v14  ;;  %v2732_v49 = vmul.f32 %v2700_v8, %v2348_v40 }
 0x3a1   : > { %v4400_v18 = vpop.eup %4399  ;;  %4415 = vrcp.f32 %v2288_v27 }
 0x3a2   : > { %4062 = vmatprep.mubr.msk.f32.mxu1 %vm729_vm1, %v2732_v49  ;;  %v4402_v33 = vpop.eup %4401  ;;  %v2703_v63 = vmul.f32 %v4400_v18, %v6144_v31 }
 0x3a3   : > { %v2640_v45 = vpop.xlane.xlu1 %2639  ;;  %4063 = vmatmul.mubr.msk.f32.gmra.mxu1 %vm729_vm1, %v2733_v59  ;;  %v4404_v56 = vpop.eup %4403  ;;  %v2350_v9 = vmul.f32 %v4402_v33, %v6145_v43 }
 0x3a4   : > { %4417 = vrcp.f32 %v2640_v45  ;;  %v2351_v26 = vmul.f32 %v4404_v56, %v6147_v2  ;;  %v6157_v2 = vld [vmem:[#allocation36_spill] sm:$0xff] }
 0x3a5   : > { %v4406_v47 = vpop.eup %4405  ;;  %4419 = vrcp.f32 %v2291_v4 }
 0x3a6   : > { %v2702_v55 = vmul.f32 %v4406_v47, %v6146_v0  ;;  %v2735_v34 = vmul.f32 %v2703_v63, %v2351_v26 }
 0x3a7   : > { %v2643_v29 = vpop.xlane.xlu1 %2642 }
 0x3a8   : > { %4421 = vrcp.f32 %v2643_v29  ;;  %v2734_v24 = vmul.f32 %v2702_v55, %v2350_v9 }
 0x3a9   : > { %v4408_v20 = vpop.eup %4407 }
 0x3aa   : > { %4065 = vmatprep.mubr.msk.f32.mxu1 %vm729_vm1, %v2734_v24  ;;  %v4410_v53 = vpop.eup %4409  ;;  %v2705_v36 = vmul.f32 %v4408_v20, %v6148_v1  ;;  %v6158_v24 = vld [vmem:[#allocation20_spill] sm:$0xff] }
 0x3ab   : > { %4066 = vmatmul.mubr.msk.f32.gmra.mxu1 %vm729_vm1, %v2735_v34  ;;  %v4412_v61 = vpop.eup %4411  ;;  %v2352_v23 = vmul.f32 %v4410_v53, %v6149_v54  ;;  %v6159_v53 = vld [vmem:[#allocation34_spill] sm:$0xff] }
 0x3ac   : > { %v2353_v7 = vmul.f32 %v4412_v61, %v6151_v51  ;;  %v6164_v51 = vld [vmem:[#allocation19_spill] sm:$0xff] }
 0x3ad   : > { %v4414_v38 = vpop.eup %4413 }
 0x3ae   : > { %v2704_v6 = vmul.f32 %v4414_v38, %v6150_v57  ;;  %v4416_v60 = vpop.eup %4415  ;;  %v2737_v17 = vmul.f32 %v2705_v36, %v2353_v7  ;;  %v6160_v38 = vld [vmem:[#allocation18_spill] sm:$0xff]  ;;  %v6161_v36 = vld [vmem:[#allocation37_spill] sm:$0xff] }
 0x3af   : > { %v2354_v13 = vmul.f32 %v4416_v60, %v6152_v52 }
 0x3b0   : > { %v2736_v27 = vmul.f32 %v2704_v6, %v2352_v23  ;;  %v6162_v23 = vld [vmem:[#allocation21_spill] sm:$0xff]  ;;  %v6163_v6 = vld [vmem:[#allocation35_spill] sm:$0xff] }
 0x3b1   : > { %v4418_v28 = vpop.eup %4417 }
 0x3b2   : > { %4068 = vmatprep.mubr.msk.f32.mxu1 %vm729_vm1, %v2736_v27  ;;  %v2706_v15 = vmul.f32 %v4418_v28, %v6153_v32  ;;  %v4420_v50 = vpop.eup %4419  ;;  %v6165_v27 = vld [vmem:[#allocation32_spill] sm:$0xff] }
 0x3b3   : > { %4069 = vmatmul.mubr.msk.f32.gmra.mxu1 %vm729_vm1, %v2737_v17  ;;  %v2355_v39 = vmul.f32 %v4420_v50, %v6154_v11  ;;  %v6166_v17 = vld [vmem:[#allocation16_spill] sm:$0xff]  ;;  %v6170_v11 = vld [vmem:[#allocation17_spill] sm:$0xff] }
 0x3b4   : > { %v2738_v21 = vmul.f32 %v2706_v15, %v2354_v13  ;;  %v6167_v13 = vld [vmem:[#allocation30_spill] sm:$0xff] }
 0x3b5   : > { %v4422_v35 = vpop.eup %4421  ;;  %v6168_v15 = vld [vmem:[#allocation14_spill] sm:$0xff] }
 0x3b6   : > { %4071 = vmatprep.mubr.msk.f32.mxu1 %vm729_vm1, %v2738_v21  ;;  %v2707_v58 = vmul.f32 %v4422_v35, %v6155_v10  ;;  %v6169_v21 = vld [vmem:[#allocation33_spill] sm:$0xff]  ;;  %v6171_v10 = vld [vmem:[#allocation31_spill] sm:$0xff] }
 0x3b8   : > { %v2739_v5 = vmul.f32 %v2707_v58, %v2355_v39 }
 0x3ba   : > { %4072 = vmatmul.mubr.msk.f32.gmra.mxu1 %vm729_vm1, %v2739_v5  ;;  %v6172_v5 = vld [vmem:[#allocation15_spill] sm:$0xff] }
 0x403   : > { %v5848_v25 = vpop.f32.mrf.mxu1 }
 0x405   : > { %v5850_v42 = vpop.f32.mrf.mxu1 }
 0x40b   : > { %v5852_v41 = vpop.f32.mrf.mxu1 }
 0x40d   : > { %v5854_v22 = vpop.f32.mrf.mxu1 }
 0x413   : > { %v5856_v30 = vpop.f32.mrf.mxu1 }
 0x415   : > { %v5858_v12 = vpop.f32.mrf.mxu1 }
 0x41b   : > { %v4037_v37 = vpop.f32.mrf.mxu1 }
 0x41d   : > { %v2937_v16 = vpop.f32.mrf.mxu1 }
 0x423   : > { %v4040_v3 = vpop.f32.mrf.mxu1 }
 0x424   : > { %v3075_v39 = vmul.f32 %v4040_v3, %v6170_v11  ;;  %v6177_v3 = vld [vmem:[#allocation29_spill] sm:$0xff] }
 0x425   : > { %v2947_v44 = vpop.f32.mrf.mxu1 }
 0x426   : > { %v3074_v62 = vmul.f32 %v2947_v44, %v6172_v5  ;;  %v6179_v44 = vld [vmem:[#allocation27_spill] sm:$0xff] }
 0x42b   : > { %v4043_v40 = vpop.f32.mrf.mxu1 }
 0x42c   : > { %v3077_v52 = vmul.f32 %v4043_v40, %v6166_v17  ;;  %v6173_v40 = vld [vmem:[#allocation28_spill] sm:$0xff] }
 0x42d   : > { %v2957_v46 = vpop.f32.mrf.mxu1 }
 0x42e   : > { %v3076_v50 = vmul.f32 %v6168_v15, %v2957_v46  ;;  %v6175_v46 = vld [vmem:[#allocation26_spill] sm:$0xff] }
 0x433   : > { %v4046_v8 = vpop.f32.mrf.mxu1 }
 0x434   : > { %v3079_v57 = vmul.f32 %v4046_v8, %v6162_v23 }
 0x435   : > { %v2967_v14 = vpop.f32.mrf.mxu1 }
 0x436   : > { %v3078_v7 = vmul.f32 %v2967_v14, %v6164_v51  ;;  %v6174_v14 = vld [vmem:[#allocation12_spill] sm:$0xff] }
 0x43b   : > { %v4049_v19 = vpop.f32.mrf.mxu1 }
 0x43c   : > { %v3081_v34 = vmul.f32 %v4049_v19, %v6158_v24  ;;  %v3073_v19 = vmul.f32 %v4037_v37, %v6174_v14  ;;  %v6185_v24 = vld [vmem:[#allocation25_spill] sm:$0xff] }
 0x43d   : > { %v2977_v48 = vpop.f32.mrf.mxu1 }
 0x43e   : > { %v3080_v1 = vmul.f32 %v6160_v38, %v2977_v48 }
 0x443   : > { %v5860_v49 = vpop.f32.mrf.mxu1 }
 0x445   : > { %v5862_v59 = vpop.f32.mrf.mxu1 }
 0x44b   : > { %v4055_v18 = vpop.f32.mrf.mxu1 }
 0x44d   : > { %v5864_v33 = vpop.f32.mrf.mxu1 }
 0x453   : > { %v4058_v4 = vpop.f32.mrf.mxu1 }
 0x455   : > { %v3007_v45 = vpop.f32.mrf.mxu1 }
 0x45b   : > { %v4061_v56 = vpop.f32.mrf.mxu1 }
 0x45c   : > { %v3089_v8 = vmul.f32 %v4061_v56, %v6173_v40  ;;  %v6180_v56 = vld [vmem:[#allocation11_spill] sm:$0xff] }
 0x45d   : > { %v3017_v47 = vpop.f32.mrf.mxu1  ;;  %v3070_v37 = vmul.f32 %v5858_v12, %v6180_v56  ;;  %v3083_v12 = vmul.f32 %v5860_v49, %v6185_v24 }
 0x45e   : > { %v3088_v48 = vmul.f32 %v6175_v46, %v3017_v47  ;;  %v6181_v47 = vld [vmem:[#allocation24_spill] sm:$0xff] }
 0x463   : > { %v4064_v31 = vpop.f32.mrf.mxu1 }
 0x464   : > { %v3091_v35 = vmul.f32 %v4064_v31, %v6169_v21  ;;  %v6176_v31 = vld [vmem:[#allocation10_spill] sm:$0xff] }
 0x465   : > { %v3027_v63 = vpop.f32.mrf.mxu1 }
 0x466   : > { %v3090_v58 = vmul.f32 %v3027_v63, %v6171_v10  ;;  %v6178_v63 = vld [vmem:[#allocation13_spill] sm:$0xff] }
 0x46b   : > { %v4067_v43 = vpop.f32.mrf.mxu1 }
 0x46c   : > { %v3093_v28 = vmul.f32 %v4067_v43, %v6165_v27  ;;  %v3072_v43 = vmul.f32 %v6176_v31, %v2937_v16  ;;  %v6182_v16 = vld [vmem:[#allocation8_spill] sm:$0xff] }
 0x46d   : > { %v3037_v9 = vpop.f32.mrf.mxu1 }
 0x46e   : > { %v3092_v32 = vmul.f32 %v6167_v13, %v3037_v9  ;;  %v3087_v9 = vmul.f32 %v4058_v4, %v6177_v3  ;;  %v6183_v4 = vld [vmem:[#allocation22_spill] sm:$0xff] }
 0x473   : > { %v4070_v0 = vpop.f32.mrf.mxu1 }
 0x474   : > { %v3095_v54 = vmul.f32 %v4070_v0, %v6161_v36  ;;  %v3071_v0 = vmul.f32 %v5856_v30, %v6178_v63  ;;  %v6184_v30 = vld [vmem:[#allocation6_spill] sm:$0xff] }
 0x475   : > { %v3047_v55 = vpop.f32.mrf.mxu1 }
 0x476   : > { %v3094_v60 = vmul.f32 %v3047_v55, %v6163_v6  ;;  %v3086_v55 = vmul.f32 %v3007_v45, %v6179_v44  ;;  %v3068_v45 = vmul.f32 %v6184_v30, %v5854_v22 }
 0x47a   : > { %v4073_v29 = vpop.f32.mrf.mxu1 }
 0x47b   : > { %v3097_v26 = vmul.f32 %v4073_v29, %v6157_v2  ;;  %v3085_v29 = vmul.f32 %v4055_v18, %v6181_v47  ;;  %v3069_v2 = vmul.f32 %v5852_v41, %v6182_v16  ;;  %v6187_v41 = vld [vmem:[#allocation23_spill] sm:$0xff] }
 0x47c   : > { %v3057_v20 = vpop.f32.mrf.mxu1 }
 0x47d   : > { %v3096_v61 = vmul.f32 %v6159_v53, %v3057_v20  ;;  %3719 = vmatprep.subr.mxu0 %v3097_v26  ;;  %v3084_v26 = vmul.f32 %v6183_v4, %v5864_v33  ;;  %v3082_v20 = vmul.f32 %v5862_v59, %v6187_v41  ;;  %v4164_v33 = vld [vmem:[%s5845_s26] ss:$8 sps:$4 sm:$0xff]   ;;  %v6188_v53 = vld [vmem:[#allocation7_spill] sm:$0xff]  ;;  %s4423_s26 = scalar_lea.vmem %s5915_s13, 256 }
 0x47e   : > { %3720 = vmatpush3.msra.mxu0 %v3081_v34  ;;  %v6186_v34 = vld [vmem:[#allocation9_spill] sm:$0xff]  ;;  %p4424_p12 = scmp.ne.s32.totalorder %s5915_s13, %s4423_s26  ;;  %p4431_p2 = scmp.lt.s32.totalorder %s4429_s1, %s4423_s26 }
 0x47f   : > { %3721 = vmatprep.subr.mxu0 %v3096_v61  ;;  %v3067_v18 = vmul.f32 %v5848_v25, %v6186_v34  ;;  %v3066_v61 = vmul.f32 %v5850_v42, %v6188_v53 }
 0x480   : > { %3722 = vmatpush3.msra.mxu0 %v3080_v1  ;;  %p4425_p13 = pnand %p4424_p12, %p4604_p4  ;;  %p4432_p3 = por %p4431_p2, %p4430_p1 }
 0x481   : > { %3723 = vmatprep.subr.mxu0 %v3095_v54 }
 0x482   : > { %3724 = vmatpush3.msra.mxu0 %v3079_v57  ;;  %p4426_p0 = pneg %p4425_p13 }
 0x483   : > { %3725 = vmatprep.subr.mxu0 %v3094_v60 }
 0x484   : > { %3726 = vmatpush3.msra.mxu0 %v3078_v7  ;;  %p4433_p5 = pnand %p4432_p3, %p4426_p0 }
 0x485   : > { %3727 = vmatprep.subr.mxu0 %v3093_v28 }
 0x486   : > { %3728 = vmatpush3.msra.mxu0 %v3077_v52 }
 0x487   : > { %3729 = vmatprep.subr.mxu0 %v3092_v32 }
 0x488   : > { %3730 = vmatpush3.msra.mxu0 %v3076_v50 }
 0x489   : > { %3731 = vmatprep.subr.mxu0 %v3091_v35 }
 0x48a   : > { %3732 = vmatpush3.msra.mxu0 %v3075_v39 }
 0x48b   : > { %3733 = vmatprep.subr.mxu0 %v3090_v58 }
 0x48c   : > { %3734 = vmatpush3.msra.mxu0 %v3074_v62 }
 0x48d   : > { %3735 = vmatprep.subr.mxu0 %v3089_v8 }
 0x48e   : > { %3736 = vmatpush3.msra.mxu0 %v3073_v19 }
 0x48f   : > { %3737 = vmatprep.subr.mxu0 %v3088_v48 }
 0x490   : > { %3738 = vmatpush3.msra.mxu0 %v3072_v43 }
 0x491   : > { %3739 = vmatprep.subr.mxu0 %v3087_v9 }
 0x492   : > { %3740 = vmatpush3.msra.mxu0 %v3071_v0 }
 0x493   : > { %3741 = vmatprep.subr.mxu0 %v3086_v55 }
 0x494   : > { %3742 = vmatpush3.msra.mxu0 %v3070_v37 }
 0x495   : > { %3743 = vmatprep.subr.mxu0 %v3085_v29 }
 0x496   : > { %3744 = vmatpush3.msra.mxu0 %v3069_v2 }
 0x497   : > { %3745 = vmatprep.subr.mxu0 %v3084_v26 }
 0x498   : > { %3746 = vmatpush3.msra.mxu0 %v3068_v45 }
 0x499   : > { %3747 = vmatprep.subr.mxu0 %v3083_v12 }
 0x49a   : > { %3748 = vmatpush3.msra.mxu0 %v3067_v18 }
 0x49b   : > { %3749 = vmatprep.subr.mxu0 %v3082_v20 }
 0x49c   : > { %3750 = vmatpush3.msra.mxu0 %v3066_v61 }
 0x49d   : > { %3177 = vmatmul.mubr.bf16.vlgmr.msra.gmra.mxu0 %v4164_v33 }
 0x55d   : > { %v3751_v22 = vpop.f32.mrf.mxu0 }
 0x55f   : > { %v3752_v49 = vpop.f32.mrf.mxu0 }
 0x560   : > { %v3753_v25 = vadd.f32 %v3752_v49, %v3751_v22 }
 0x561   : > { %v3754_v38 = vpop.f32.mrf.mxu0 }
 0x562   : > { %3187 = vst [vmem:[%s562_s0] sm:$0xff] %v3753_v25 }
 0x563   : > { %v3755_v59 = vpop.f32.mrf.mxu0 }
 0x564   : > { %v3756_v1 = vadd.f32 %v3755_v59, %v3754_v38 }
 0x566   : > { %3188 = vst [vmem:[%s562_s0 + $0x8] sm:$0xff] %v3756_v1 }
 0x567   : > { %4436 = shalt.err (!%p4433_p5)
}
 0x568   : > { %s4437_s12 = scalar_lea.hbm %s5913_s15, 256  ;;  %s4441_s16 = scalar_lea.hbm %s5973_s11, 768 }
 0x569   : > { %p4438_p6 = scmp.ne.s32.totalorder %s5913_s15, %s4437_s12  ;;  %p4442_p10 = scmp.lt.s32.totalorder %s5913_s15, %s5973_s11 }
 0x56a   : > { %p4443_p11 = scmp.lt.s32.totalorder %s4441_s16, %s4437_s12 }
 0x56b   : > { %p4439_p7 = pnand %p4438_p6, %p4604_p4 }
 0x56c   : > { %p4444_p12 = por %p4443_p11, %p4442_p10 }
 0x56d   : > { %p4440_p9 = pneg %p4439_p7 }
 0x56f   : > { %p4445_p13 = pnand %p4444_p12, %p4440_p9 }
 0x571   : > { %4448 = shalt.err (!%p4445_p13)
}
 0x572   : > { %s4502_s1 = smov 128   ;;  %s4503_s26 = smov 8  }
 0x573   : > { %4074 = dma.vmem_to_hbm [thread:$0]  (%p4604_p4), %s5915_s13, 256, %s5913_s15, %s5917_s23, %s4502_s1, %s4502_s1, %s4503_s26  }
 0x574 PF: > { %p4080_p0 = scmp.ge.s32.totalorder %s4499_s22, 2  ;;  %s3218_s28 = sand.u32 1, %s4479_s17  }
 0x575   : > { %s3219_s12 = scalar_lea.sflag [#allocation4], %s3218_s28 }
 0x576   : > { %p4077_p1 = pnand %p4080_p0, %p4611_p8 }
 0x578   : > { %p4078_p2 = pneg %p4077_p1 }
 0x57a   : > { %4474 = dma.done.wait (%p4078_p2), %s3219_s12, 256  }
 0x57b   : > { %4476 = vsyncadd (%p4078_p2), %s3219_s12, 4294967040  ;;  %s24_s22 = sadd.s32 1, %s4499_s22   ;;  %s6189_s17 = smov %s4483_s18 }
 0x57c   : > { %p21_p3 = scmp.ge.s32.totalorder %s24_s22, 5   ;;  %s6190_s18 = smov %s4487_s19 }
 0x57d   : > { %s6191_s19 = smov %s4617_s30  ;;  %s6192_s20 = smov %s4495_s21 }
 0x57e   : > { %s6193_s21 = smov %s6195_s25  ;;  %23 = sbr.rel (!%p21_p3) target bundleno = 7 (0x7), region = 130 }
 0x583   :  { %3224 = vsyncpa [#allocation4], 1 }
 0x584   :  { %3226 = vsyncpa [#allocation4 + $0x1], 1 }

</bundles_post_ra>
